<compile_context>
chip_gen: v7x
topology: tpu7x:2x2x1
jax: 0.10.0
libtpu: 0.0.40
codegen_flags: <defaults>
</compile_context>

<pallas_src>
import functools

import jax
import jax.numpy as jnp
from jax import lax
from jax.experimental import pallas as pl
from jax.experimental.pallas import tpu as pltpu

_BN_EPS = 1e-5
_CP_ALIGN = 8   # f32 sublane tile -> keeps every in-kernel sublane concat aligned


# ------------------------------- Pallas kernel ------------------------------ #

def _rsu2_kernel(x_ref, w_ref, b_ref, m_ref, o_ref, *, W):
    B, CP, HW = x_ref.shape
    N = B * HW
    f32, bf16 = jnp.float32, jnp.bfloat16

    # Lane-dense activations: (CP, B*H*W).  Batch is folded onto the lane axis; cyclic rolls
    # that cross image/batch boundaries are always zeroed by the precomputed masks.
    x = jnp.concatenate([x_ref[b] for b in range(B)], axis=1)          # (CP, N) f32

    def im2col(acts, d):
        # One (len(acts)*9*CP, N) bf16 patch matrix: each tap is a lane roll of the lane-dense
        # activation (XLU) times its boundary mask (f32 VPU), stacked along the contraction
        # axis (aligned concat: CP % 8 == 0), then cast to bf16 once per layer.
        di = d - 1
        pieces = []
        for a in acts:
            for ky in range(3):
                for kx in range(3):
                    dy, dx = ky - 1, kx - 1
                    s = (dy * W + dx) * d                               # flat-index shift
                    piece = a if s == 0 else pltpu.roll(a, shift=(-s) % N, axis=1)
                    if not (dy == 0 and dx == 0):
                        piece = piece * m_ref[di, ky * 3 + kx]          # (1, N) boundary mask
                    pieces.append(piece)
        return jnp.concatenate(pieces, axis=0).astype(bf16)            # (K, N)

    def conv_bn_relu(acts, d, layer):
        patch = im2col(acts, d)                                        # (K, N) bf16
        wl = w_ref[layer][:, :patch.shape[0]]                          # (CP, K) bf16
        acc = lax.dot_general(wl, patch, (((1,), (0,)), ((), ())),
                              preferred_element_type=f32)              # (CP, N) f32
        return jnp.maximum(acc + b_ref[layer], 0.0)                    # folded BN bias + ReLU

    hxin = conv_bn_relu([x], 1, 0)            # rebnconvin : in_ch  -> out_ch, dirate=1
    hx1 = conv_bn_relu([hxin], 1, 1)          # rebnconv1  : out_ch -> mid_ch, dirate=1
    hx2 = conv_bn_relu([hx1], 2, 2)           # rebnconv2  : mid_ch -> mid_ch, dirate=2
    hx1d = conv_bn_relu([hx1, hx2], 1, 3)     # rebnconv1d : cat(hx1,hx2) -> out_ch, dirate=1

    res = hx1d + hxin                         # residual, still lane-dense (CP, N) f32
    cout = o_ref.shape[1]
    for b in range(B):                        # lane offsets are multiples of 128 -> aligned
        o_ref[b] = res[:cout, b * HW:(b + 1) * HW].astype(o_ref.dtype)


# --------------------------------- Wrapper ---------------------------------- #

def _fold_bn_flat(w, conv_b, gamma, beta, mean, var, *, cp):
    """Fold eval-mode BN into the conv and flatten to the im2col layout.

    Returns (w_flat, bias): w_flat is (cp, 9*cp) with column = (ky*3+kx)*cp + ci, zero-padded
    in both channel dims to cp; bias is (cp,) zero-padded.
    """
    cout, cin = w.shape[0], w.shape[1]
    scale = gamma / jnp.sqrt(var + _BN_EPS)
    bias = beta + scale * (conv_b - mean)
    wf = jnp.transpose(w * scale[:, None, None, None], (0, 2, 3, 1))   # (Cout, ky, kx, Cin)
    wf = jnp.pad(wf, ((0, cp - cout), (0, 0), (0, 0), (0, cp - cin)))
    return wf.reshape(cp, 9 * cp), jnp.pad(bias, (0, cp - cout))


def rsu2_forward(x_nchw, params):
    """RSU2 forward (encoder=True). Input/output are NCHW like PyTorch."""
    B, cin, H, W = x_nchw.shape
    HW = H * W
    N = B * HW
    f32, bf16 = jnp.float32, jnp.bfloat16

    cout = params["in"][0].shape[0]
    cmid = params["c1"][0].shape[0]
    CP = ((max(cin, cout, cmid) + _CP_ALIGN - 1) // _CP_ALIGN) * _CP_ALIGN
    KMAX = 18 * CP

    # Folded + flattened weights (bf16 slab) and biases (f32 slab).
    w_in_f, b_in = _fold_bn_flat(*params["in"], cp=CP)
    w1_f, b1 = _fold_bn_flat(*params["c1"], cp=CP)
    w2_f, b2 = _fold_bn_flat(*params["c2"], cp=CP)
    # rebnconv1d: split the 2*mid input channels into hx1 / hx2 halves (torch.cat is never
    # materialized); the shared layer bias is applied exactly once.
    w1d, cb, g, be, mu, va = params["c1d"]
    w1da_f, b1d = _fold_bn_flat(w1d[:, :cmid], cb, g, be, mu, va, cp=CP)
    w1db_f, _ = _fold_bn_flat(w1d[:, cmid:], cb, g, be, mu, va, cp=CP)
    w1d_f = jnp.concatenate([w1da_f, w1db_f], axis=1)                  # (CP, 18*CP)

    def padk(wl):
        return jnp.pad(wl, ((0, 0), (0, KMAX - wl.shape[1])))

    w_slab = jnp.stack([padk(w_in_f), padk(w1_f), padk(w2_f), w1d_f]).astype(bf16)  # (4,CP,KMAX)
    b_slab = jnp.stack([b_in, b1, b2, b1d]).reshape(4, CP, 1).astype(f32)           # (4,CP,1)

    # Host-precomputed boundary masks: m_slab[d-1, ky*3+kx, 0, p] = 1 iff the tap-shifted pixel
    # for flat lane position p stays inside its own image (also kills cross-batch roll wrap).
    p = jnp.arange(N, dtype=jnp.int32)
    hh = (p % HW) // W
    ww = p % W
    masks = []
    for d in (1, 2):
        for ky in range(3):
            for kx in range(3):
                dy, dx = ky - 1, kx - 1
                ok = ((hh + dy * d >= 0) & (hh + dy * d < H) &
                      (ww + dx * d >= 0) & (ww + dx * d < W))
                masks.append(ok)
    m_slab = jnp.stack(masks).astype(f32).reshape(2, 9, 1, N)

    # NCHW -> (B, C, H*W) is a free reshape; zero-pad channels to CP (tiny one-time HBM op that
    # keeps every sublane offset tile-aligned; padded channels hit zero weight columns).
    x_in = jnp.pad(x_nchw.reshape(B, cin, HW), ((0, 0), (0, CP - cin), (0, 0)))

    out = pl.pallas_call(
        functools.partial(_rsu2_kernel, W=W),
        out_shape=jax.ShapeDtypeStruct((B, cout, HW), x_nchw.dtype),
        grid=(1,),
        in_specs=[
            pl.BlockSpec((B, CP, HW), lambda i: (0, 0, 0)),
            pl.BlockSpec((4, CP, KMAX), lambda i: (0, 0, 0)),
            pl.BlockSpec((4, CP, 1), lambda i: (0, 0, 0)),
            pl.BlockSpec((2, 9, 1, N), lambda i: (0, 0, 0, 0)),
        ],
        out_specs=pl.BlockSpec((B, cout, HW), lambda i: (0, 0, 0)),
        compiler_params=pltpu.CompilerParams(
            dimension_semantics=("arbitrary",),
            vmem_limit_bytes=32 * 1024 * 1024),
    )(x_in, w_slab, b_slab, m_slab)
    return out.reshape(B, cout, H, W)   # free reshape: kernel already emitted NCHW-flat


# --------------------------- Pure-JAX references ----------------------------- #

def _ref_cbr_exact(x_nhwc, w, conv_b, gamma, beta, mean, var, *, dil):
    """Reference matching the kernel numerics (folded BN, bf16 operands, f32 accumulation)."""
    B, H, W, Ci = x_nhwc.shape
    Co = w.shape[0]
    scale = gamma / jnp.sqrt(var + _BN_EPS)
    bias = beta - scale * mean + scale * conv_b
    wf = (jnp.transpose(w, (2, 3, 1, 0)) * scale[None, None, None, :]).astype(jnp.bfloat16)
    xp = jnp.pad(x_nhwc.astype(jnp.bfloat16),
                 ((0, 0), (dil, dil), (dil, dil), (0, 0)))
    acc = jnp.zeros((B, H, W, Co), jnp.float32)
    for ky in range(3):
        for kx in range(3):
            patch = xp[:, ky * dil:ky * dil + H, kx * dil:kx * dil + W, :]
            acc = acc + jnp.dot(patch.reshape(-1, Ci), wf[ky, kx],
                                preferred_element_type=jnp.float32).reshape(B, H, W, Co)
    return jnp.maximum(acc + bias, 0.0)


def rsu2_ref_exact(x_nchw, params):
    x = jnp.transpose(x_nchw, (0, 2, 3, 1))
    hxin = _ref_cbr_exact(x, *params["in"], dil=1)
    hx1 = _ref_cbr_exact(hxin, *params["c1"], dil=1)
    hx2 = _ref_cbr_exact(hx1, *params["c2"], dil=2)
    hx1d = _ref_cbr_exact(jnp.concatenate([hx1, hx2], -1), *params["c1d"], dil=1)
    return jnp.transpose(hx1d + hxin, (0, 3, 1, 2))


def _ref_cbr_f32(x_nhwc, w, conv_b, gamma, beta, mean, var, *, dil):
    y = lax.conv_general_dilated(
        x_nhwc, jnp.transpose(w, (2, 3, 1, 0)),
        window_strides=(1, 1), padding=((dil, dil), (dil, dil)),
        rhs_dilation=(dil, dil), dimension_numbers=("NHWC", "HWIO", "NHWC"),
        precision=lax.Precision.HIGHEST)
    y = gamma * (y + conv_b - mean) / jnp.sqrt(var + _BN_EPS) + beta
    return jnp.maximum(y, 0.0)


def rsu2_ref_f32(x_nchw, params):
    x = jnp.transpose(x_nchw, (0, 2, 3, 1))
    hxin = _ref_cbr_f32(x, *params["in"], dil=1)
    hx1 = _ref_cbr_f32(hxin, *params["c1"], dil=1)
    hx2 = _ref_cbr_f32(hx1, *params["c2"], dil=2)
    hx1d = _ref_cbr_f32(jnp.concatenate([hx1, hx2], -1), *params["c1d"], dil=1)
    return jnp.transpose(hx1d + hxin, (0, 3, 1, 2))


# -------------------------------- Param init --------------------------------- #

def init_conv_bn(key, cin, cout):
    k1, k2, k3, k4, k5, k6 = jax.random.split(key, 6)
    w = 0.1 * jax.random.normal(k1, (cout, cin, 3, 3), jnp.float32)
    b = 0.1 * jax.random.normal(k2, (cout,), jnp.float32)
    gamma = 1.0 + 0.1 * jax.random.normal(k3, (cout,), jnp.float32)
    beta = 0.1 * jax.random.normal(k4, (cout,), jnp.float32)
    mean = 0.1 * jax.random.normal(k5, (cout,), jnp.float32)
    var = 1.0 + 0.1 * jax.random.uniform(k6, (cout,), jnp.float32)
    return (w, b, gamma, beta, mean, var)


if __name__ == "__main__":
    in_ch, mid_ch, out_ch = 4, 8, 4
    B, H, W = 2, 16, 16

    root = jax.random.PRNGKey(0)
    kx, kin, k1, k2, k1d = jax.random.split(root, 5)

    params = {
        "in":  init_conv_bn(kin, in_ch, out_ch),        # rebnconvin: in_ch -> out_ch, dirate=1
        "c1":  init_conv_bn(k1, out_ch, mid_ch),        # rebnconv1:  out_ch -> mid_ch, dirate=1
        "c2":  init_conv_bn(k2, mid_ch, mid_ch),        # rebnconv2:  mid_ch -> mid_ch, dirate=2
        "c1d": init_conv_bn(k1d, 2 * mid_ch, out_ch),   # rebnconv1d: 2*mid_ch -> out_ch, dirate=1
    }

    x = jax.random.normal(kx, (B, in_ch, H, W), jnp.float32)

    out = jax.block_until_ready(jax.jit(rsu2_forward)(x, params))
    assert out.shape == (B, out_ch, H, W), out.shape

    # Tight check against a reference with identical numerics (bf16 operands, f32 accumulation).
    ref_exact = jax.block_until_ready(rsu2_ref_exact(x, params))
    assert jnp.allclose(out, ref_exact, rtol=2e-3, atol=2e-3), (
        float(jnp.max(jnp.abs(out - ref_exact))))

    # Loose sanity check against the full-f32 semantics of the PyTorch module.
    ref_f32 = jax.block_until_ready(rsu2_ref_f32(x, params))
    assert jnp.allclose(out, ref_f32, rtol=1e-1, atol=1e-1), (
        float(jnp.max(jnp.abs(out - ref_f32))))

    print("KERNEL_OK")
</pallas_src>

<mosaic_0001>
module attributes {stable_mosaic.version = 11 : i64} {
  func.func @_rsu2_kernel(%arg0: i32, %arg1: memref<2x8x256xf32, #tpu.memory_space<vmem>>, %arg2: memref<4x8x144xbf16, #tpu.memory_space<vmem>>, %arg3: memref<4x8x1xf32, #tpu.memory_space<vmem>>, %arg4: memref<2x9x1x512xf32, #tpu.memory_space<vmem>>, %arg5: memref<2x4x256xf32, #tpu.memory_space<vmem>>) attributes {dimension_semantics = [#tpu.dimension_semantics<arbitrary>], iteration_bounds = array<i64: 1>, scalar_prefetch = 0 : i64, scratch_operands = 0 : i64, tpu.core_type = #tpu.core_type<tc>, window_params = [{pipeline_mode = #tpu.pipeline_mode<synchronous>, transform_indices = @transform_0, window_bounds = array<i64: 2, 8, 256>}, {pipeline_mode = #tpu.pipeline_mode<synchronous>, transform_indices = @transform_1, window_bounds = array<i64: 4, 8, 144>}, {pipeline_mode = #tpu.pipeline_mode<synchronous>, transform_indices = @transform_2, window_bounds = array<i64: 4, 8, 1>}, {pipeline_mode = #tpu.pipeline_mode<synchronous>, transform_indices = @transform_3, window_bounds = array<i64: 2, 9, 1, 512>}, {pipeline_mode = #tpu.pipeline_mode<synchronous>, transform_indices = @transform_4, window_bounds = array<i64: 2, 4, 256>}]} {
    %c0 = arith.constant 0 : index
    %c0_0 = arith.constant 0 : index
    %c0_1 = arith.constant 0 : index
    %0 = vector.load %arg1[%c0, %c0_0, %c0_1] : memref<2x8x256xf32, #tpu.memory_space<vmem>>, vector<1x8x256xf32>
    %1 = vector.shape_cast %0 : vector<1x8x256xf32> to vector<8x256xf32>
    %c1 = arith.constant 1 : index
    %c0_2 = arith.constant 0 : index
    %c0_3 = arith.constant 0 : index
    %2 = vector.load %arg1[%c1, %c0_2, %c0_3] : memref<2x8x256xf32, #tpu.memory_space<vmem>>, vector<1x8x256xf32>
    %3 = vector.shape_cast %2 : vector<1x8x256xf32> to vector<8x256xf32>
    %4 = tpu.concatenate %1, %3 in 1 : vector<8x256xf32>, vector<8x256xf32> -> vector<8x512xf32>
    %c17_i32 = arith.constant 17 : i32
    %5 = tpu.dynamic_rotate %4 by %c17_i32 dim 1 : vector<8x512xf32>, i32 -> vector<8x512xf32>
    %c0_4 = arith.constant 0 : index
    %c0_5 = arith.constant 0 : index
    %c0_6 = arith.constant 0 : index
    %c0_7 = arith.constant 0 : index
    %6 = vector.load %arg4[%c0_4, %c0_5, %c0_6, %c0_7] : memref<2x9x1x512xf32, #tpu.memory_space<vmem>>, vector<1x1x1x512xf32>
    %7 = vector.shape_cast %6 : vector<1x1x1x512xf32> to vector<1x512xf32>
    %8 = vector.broadcast %7 : vector<1x512xf32> to vector<8x512xf32>
    %9 = arith.mulf %5, %8 : vector<8x512xf32>
    %c16_i32 = arith.constant 16 : i32
    %10 = tpu.dynamic_rotate %4 by %c16_i32 dim 1 : vector<8x512xf32>, i32 -> vector<8x512xf32>
    %c0_8 = arith.constant 0 : index
    %c1_9 = arith.constant 1 : index
    %c0_10 = arith.constant 0 : index
    %c0_11 = arith.constant 0 : index
    %11 = vector.load %arg4[%c0_8, %c1_9, %c0_10, %c0_11] : memref<2x9x1x512xf32, #tpu.memory_space<vmem>>, vector<1x1x1x512xf32>
    %12 = vector.shape_cast %11 : vector<1x1x1x512xf32> to vector<1x512xf32>
    %13 = vector.broadcast %12 : vector<1x512xf32> to vector<8x512xf32>
    %14 = arith.mulf %10, %13 : vector<8x512xf32>
    %c15_i32 = arith.constant 15 : i32
    %15 = tpu.dynamic_rotate %4 by %c15_i32 dim 1 : vector<8x512xf32>, i32 -> vector<8x512xf32>
    %c0_12 = arith.constant 0 : index
    %c2 = arith.constant 2 : index
    %c0_13 = arith.constant 0 : index
    %c0_14 = arith.constant 0 : index
    %16 = vector.load %arg4[%c0_12, %c2, %c0_13, %c0_14] : memref<2x9x1x512xf32, #tpu.memory_space<vmem>>, vector<1x1x1x512xf32>
    %17 = vector.shape_cast %16 : vector<1x1x1x512xf32> to vector<1x512xf32>
    %18 = vector.broadcast %17 : vector<1x512xf32> to vector<8x512xf32>
    %19 = arith.mulf %15, %18 : vector<8x512xf32>
    %c1_i32 = arith.constant 1 : i32
    %20 = tpu.dynamic_rotate %4 by %c1_i32 dim 1 : vector<8x512xf32>, i32 -> vector<8x512xf32>
    %c0_15 = arith.constant 0 : index
    %c3 = arith.constant 3 : index
    %c0_16 = arith.constant 0 : index
    %c0_17 = arith.constant 0 : index
    %21 = vector.load %arg4[%c0_15, %c3, %c0_16, %c0_17] : memref<2x9x1x512xf32, #tpu.memory_space<vmem>>, vector<1x1x1x512xf32>
    %22 = vector.shape_cast %21 : vector<1x1x1x512xf32> to vector<1x512xf32>
    %23 = vector.broadcast %22 : vector<1x512xf32> to vector<8x512xf32>
    %24 = arith.mulf %20, %23 : vector<8x512xf32>
    %c511_i32 = arith.constant 511 : i32
    %25 = tpu.dynamic_rotate %4 by %c511_i32 dim 1 : vector<8x512xf32>, i32 -> vector<8x512xf32>
    %c0_18 = arith.constant 0 : index
    %c5 = arith.constant 5 : index
    %c0_19 = arith.constant 0 : index
    %c0_20 = arith.constant 0 : index
    %26 = vector.load %arg4[%c0_18, %c5, %c0_19, %c0_20] : memref<2x9x1x512xf32, #tpu.memory_space<vmem>>, vector<1x1x1x512xf32>
    %27 = vector.shape_cast %26 : vector<1x1x1x512xf32> to vector<1x512xf32>
    %28 = vector.broadcast %27 : vector<1x512xf32> to vector<8x512xf32>
    %29 = arith.mulf %25, %28 : vector<8x512xf32>
    %c497_i32 = arith.constant 497 : i32
    %30 = tpu.dynamic_rotate %4 by %c497_i32 dim 1 : vector<8x512xf32>, i32 -> vector<8x512xf32>
    %c0_21 = arith.constant 0 : index
    %c6 = arith.constant 6 : index
    %c0_22 = arith.constant 0 : index
    %c0_23 = arith.constant 0 : index
    %31 = vector.load %arg4[%c0_21, %c6, %c0_22, %c0_23] : memref<2x9x1x512xf32, #tpu.memory_space<vmem>>, vector<1x1x1x512xf32>
    %32 = vector.shape_cast %31 : vector<1x1x1x512xf32> to vector<1x512xf32>
    %33 = vector.broadcast %32 : vector<1x512xf32> to vector<8x512xf32>
    %34 = arith.mulf %30, %33 : vector<8x512xf32>
    %c496_i32 = arith.constant 496 : i32
    %35 = tpu.dynamic_rotate %4 by %c496_i32 dim 1 : vector<8x512xf32>, i32 -> vector<8x512xf32>
    %c0_24 = arith.constant 0 : index
    %c7 = arith.constant 7 : index
    %c0_25 = arith.constant 0 : index
    %c0_26 = arith.constant 0 : index
    %36 = vector.load %arg4[%c0_24, %c7, %c0_25, %c0_26] : memref<2x9x1x512xf32, #tpu.memory_space<vmem>>, vector<1x1x1x512xf32>
    %37 = vector.shape_cast %36 : vector<1x1x1x512xf32> to vector<1x512xf32>
    %38 = vector.broadcast %37 : vector<1x512xf32> to vector<8x512xf32>
    %39 = arith.mulf %35, %38 : vector<8x512xf32>
    %c495_i32 = arith.constant 495 : i32
    %40 = tpu.dynamic_rotate %4 by %c495_i32 dim 1 : vector<8x512xf32>, i32 -> vector<8x512xf32>
    %c0_27 = arith.constant 0 : index
    %c8 = arith.constant 8 : index
    %c0_28 = arith.constant 0 : index
    %c0_29 = arith.constant 0 : index
    %41 = vector.load %arg4[%c0_27, %c8, %c0_28, %c0_29] : memref<2x9x1x512xf32, #tpu.memory_space<vmem>>, vector<1x1x1x512xf32>
    %42 = vector.shape_cast %41 : vector<1x1x1x512xf32> to vector<1x512xf32>
    %43 = vector.broadcast %42 : vector<1x512xf32> to vector<8x512xf32>
    %44 = arith.mulf %40, %43 : vector<8x512xf32>
    %45 = tpu.concatenate %9, %14, %19, %24, %4, %29, %34, %39, %44 in 0 : vector<8x512xf32>, vector<8x512xf32>, vector<8x512xf32>, vector<8x512xf32>, vector<8x512xf32>, vector<8x512xf32>, vector<8x512xf32>, vector<8x512xf32>, vector<8x512xf32> -> vector<72x512xf32>
    %46 = arith.truncf %45 : vector<72x512xf32> to vector<72x512xbf16>
    %c0_30 = arith.constant 0 : index
    %c0_31 = arith.constant 0 : index
    %c0_32 = arith.constant 0 : index
    %47 = vector.load %arg2[%c0_30, %c0_31, %c0_32] : memref<4x8x144xbf16, #tpu.memory_space<vmem>>, vector<1x8x144xbf16>
    %48 = vector.shape_cast %47 : vector<1x8x144xbf16> to vector<8x144xbf16>
    %49 = vector.extract_strided_slice %48 {offsets = [0, 0], sizes = [8, 72], strides = [1, 1]} : vector<8x144xbf16> to vector<8x72xbf16>
    %cst = arith.constant dense<0.000000e+00> : vector<8x512xf32>
    %50 = tpu.matmul %49, %46, %cst {dimension_numbers = #tpu.dot_dimension_numbers<[1], [0], [0], [1], [0, 0, 1, 1], [], []>} : vector<8x72xbf16>, vector<72x512xbf16>, vector<8x512xf32> -> vector<8x512xf32>
    %c0_33 = arith.constant 0 : index
    %c0_34 = arith.constant 0 : index
    %c0_35 = arith.constant 0 : index
    %51 = vector.load %arg3[%c0_33, %c0_34, %c0_35] : memref<4x8x1xf32, #tpu.memory_space<vmem>>, vector<1x8x1xf32>
    %52 = vector.shape_cast %51 : vector<1x8x1xf32> to vector<8x1xf32>
    %53 = vector.broadcast %52 : vector<8x1xf32> to vector<8x512xf32>
    %54 = arith.addf %50, %53 : vector<8x512xf32>
    %cst_36 = arith.constant 0.000000e+00 : f32
    %55 = vector.broadcast %cst_36 : f32 to vector<8x512xf32>
    %56 = arith.maximumf %54, %55 : vector<8x512xf32>
    %c17_i32_37 = arith.constant 17 : i32
    %57 = tpu.dynamic_rotate %56 by %c17_i32_37 dim 1 : vector<8x512xf32>, i32 -> vector<8x512xf32>
    %c0_38 = arith.constant 0 : index
    %c0_39 = arith.constant 0 : index
    %c0_40 = arith.constant 0 : index
    %c0_41 = arith.constant 0 : index
    %58 = vector.load %arg4[%c0_38, %c0_39, %c0_40, %c0_41] : memref<2x9x1x512xf32, #tpu.memory_space<vmem>>, vector<1x1x1x512xf32>
    %59 = vector.shape_cast %58 : vector<1x1x1x512xf32> to vector<1x512xf32>
    %60 = vector.broadcast %59 : vector<1x512xf32> to vector<8x512xf32>
    %61 = arith.mulf %57, %60 : vector<8x512xf32>
    %c16_i32_42 = arith.constant 16 : i32
    %62 = tpu.dynamic_rotate %56 by %c16_i32_42 dim 1 : vector<8x512xf32>, i32 -> vector<8x512xf32>
    %c0_43 = arith.constant 0 : index
    %c1_44 = arith.constant 1 : index
    %c0_45 = arith.constant 0 : index
    %c0_46 = arith.constant 0 : index
    %63 = vector.load %arg4[%c0_43, %c1_44, %c0_45, %c0_46] : memref<2x9x1x512xf32, #tpu.memory_space<vmem>>, vector<1x1x1x512xf32>
    %64 = vector.shape_cast %63 : vector<1x1x1x512xf32> to vector<1x512xf32>
    %65 = vector.broadcast %64 : vector<1x512xf32> to vector<8x512xf32>
    %66 = arith.mulf %62, %65 : vector<8x512xf32>
    %c15_i32_47 = arith.constant 15 : i32
    %67 = tpu.dynamic_rotate %56 by %c15_i32_47 dim 1 : vector<8x512xf32>, i32 -> vector<8x512xf32>
    %c0_48 = arith.constant 0 : index
    %c2_49 = arith.constant 2 : index
    %c0_50 = arith.constant 0 : index
    %c0_51 = arith.constant 0 : index
    %68 = vector.load %arg4[%c0_48, %c2_49, %c0_50, %c0_51] : memref<2x9x1x512xf32, #tpu.memory_space<vmem>>, vector<1x1x1x512xf32>
    %69 = vector.shape_cast %68 : vector<1x1x1x512xf32> to vector<1x512xf32>
    %70 = vector.broadcast %69 : vector<1x512xf32> to vector<8x512xf32>
    %71 = arith.mulf %67, %70 : vector<8x512xf32>
    %c1_i32_52 = arith.constant 1 : i32
    %72 = tpu.dynamic_rotate %56 by %c1_i32_52 dim 1 : vector<8x512xf32>, i32 -> vector<8x512xf32>
    %c0_53 = arith.constant 0 : index
    %c3_54 = arith.constant 3 : index
    %c0_55 = arith.constant 0 : index
    %c0_56 = arith.constant 0 : index
    %73 = vector.load %arg4[%c0_53, %c3_54, %c0_55, %c0_56] : memref<2x9x1x512xf32, #tpu.memory_space<vmem>>, vector<1x1x1x512xf32>
    %74 = vector.shape_cast %73 : vector<1x1x1x512xf32> to vector<1x512xf32>
    %75 = vector.broadcast %74 : vector<1x512xf32> to vector<8x512xf32>
    %76 = arith.mulf %72, %75 : vector<8x512xf32>
    %c511_i32_57 = arith.constant 511 : i32
    %77 = tpu.dynamic_rotate %56 by %c511_i32_57 dim 1 : vector<8x512xf32>, i32 -> vector<8x512xf32>
    %c0_58 = arith.constant 0 : index
    %c5_59 = arith.constant 5 : index
    %c0_60 = arith.constant 0 : index
    %c0_61 = arith.constant 0 : index
    %78 = vector.load %arg4[%c0_58, %c5_59, %c0_60, %c0_61] : memref<2x9x1x512xf32, #tpu.memory_space<vmem>>, vector<1x1x1x512xf32>
    %79 = vector.shape_cast %78 : vector<1x1x1x512xf32> to vector<1x512xf32>
    %80 = vector.broadcast %79 : vector<1x512xf32> to vector<8x512xf32>
    %81 = arith.mulf %77, %80 : vector<8x512xf32>
    %c497_i32_62 = arith.constant 497 : i32
    %82 = tpu.dynamic_rotate %56 by %c497_i32_62 dim 1 : vector<8x512xf32>, i32 -> vector<8x512xf32>
    %c0_63 = arith.constant 0 : index
    %c6_64 = arith.constant 6 : index
    %c0_65 = arith.constant 0 : index
    %c0_66 = arith.constant 0 : index
    %83 = vector.load %arg4[%c0_63, %c6_64, %c0_65, %c0_66] : memref<2x9x1x512xf32, #tpu.memory_space<vmem>>, vector<1x1x1x512xf32>
    %84 = vector.shape_cast %83 : vector<1x1x1x512xf32> to vector<1x512xf32>
    %85 = vector.broadcast %84 : vector<1x512xf32> to vector<8x512xf32>
    %86 = arith.mulf %82, %85 : vector<8x512xf32>
    %c496_i32_67 = arith.constant 496 : i32
    %87 = tpu.dynamic_rotate %56 by %c496_i32_67 dim 1 : vector<8x512xf32>, i32 -> vector<8x512xf32>
    %c0_68 = arith.constant 0 : index
    %c7_69 = arith.constant 7 : index
    %c0_70 = arith.constant 0 : index
    %c0_71 = arith.constant 0 : index
    %88 = vector.load %arg4[%c0_68, %c7_69, %c0_70, %c0_71] : memref<2x9x1x512xf32, #tpu.memory_space<vmem>>, vector<1x1x1x512xf32>
    %89 = vector.shape_cast %88 : vector<1x1x1x512xf32> to vector<1x512xf32>
    %90 = vector.broadcast %89 : vector<1x512xf32> to vector<8x512xf32>
    %91 = arith.mulf %87, %90 : vector<8x512xf32>
    %c495_i32_72 = arith.constant 495 : i32
    %92 = tpu.dynamic_rotate %56 by %c495_i32_72 dim 1 : vector<8x512xf32>, i32 -> vector<8x512xf32>
    %c0_73 = arith.constant 0 : index
    %c8_74 = arith.constant 8 : index
    %c0_75 = arith.constant 0 : index
    %c0_76 = arith.constant 0 : index
    %93 = vector.load %arg4[%c0_73, %c8_74, %c0_75, %c0_76] : memref<2x9x1x512xf32, #tpu.memory_space<vmem>>, vector<1x1x1x512xf32>
    %94 = vector.shape_cast %93 : vector<1x1x1x512xf32> to vector<1x512xf32>
    %95 = vector.broadcast %94 : vector<1x512xf32> to vector<8x512xf32>
    %96 = arith.mulf %92, %95 : vector<8x512xf32>
    %97 = tpu.concatenate %61, %66, %71, %76, %56, %81, %86, %91, %96 in 0 : vector<8x512xf32>, vector<8x512xf32>, vector<8x512xf32>, vector<8x512xf32>, vector<8x512xf32>, vector<8x512xf32>, vector<8x512xf32>, vector<8x512xf32>, vector<8x512xf32> -> vector<72x512xf32>
    %98 = arith.truncf %97 : vector<72x512xf32> to vector<72x512xbf16>
    %c1_77 = arith.constant 1 : index
    %c0_78 = arith.constant 0 : index
    %c0_79 = arith.constant 0 : index
    %99 = vector.load %arg2[%c1_77, %c0_78, %c0_79] : memref<4x8x144xbf16, #tpu.memory_space<vmem>>, vector<1x8x144xbf16>
    %100 = vector.shape_cast %99 : vector<1x8x144xbf16> to vector<8x144xbf16>
    %101 = vector.extract_strided_slice %100 {offsets = [0, 0], sizes = [8, 72], strides = [1, 1]} : vector<8x144xbf16> to vector<8x72xbf16>
    %cst_80 = arith.constant dense<0.000000e+00> : vector<8x512xf32>
    %102 = tpu.matmul %101, %98, %cst_80 {dimension_numbers = #tpu.dot_dimension_numbers<[1], [0], [0], [1], [0, 0, 1, 1], [], []>} : vector<8x72xbf16>, vector<72x512xbf16>, vector<8x512xf32> -> vector<8x512xf32>
    %c1_81 = arith.constant 1 : index
    %c0_82 = arith.constant 0 : index
    %c0_83 = arith.constant 0 : index
    %103 = vector.load %arg3[%c1_81, %c0_82, %c0_83] : memref<4x8x1xf32, #tpu.memory_space<vmem>>, vector<1x8x1xf32>
    %104 = vector.shape_cast %103 : vector<1x8x1xf32> to vector<8x1xf32>
    %105 = vector.broadcast %104 : vector<8x1xf32> to vector<8x512xf32>
    %106 = arith.addf %102, %105 : vector<8x512xf32>
    %cst_84 = arith.constant 0.000000e+00 : f32
    %107 = vector.broadcast %cst_84 : f32 to vector<8x512xf32>
    %108 = arith.maximumf %106, %107 : vector<8x512xf32>
    %c34_i32 = arith.constant 34 : i32
    %109 = tpu.dynamic_rotate %108 by %c34_i32 dim 1 : vector<8x512xf32>, i32 -> vector<8x512xf32>
    %c1_85 = arith.constant 1 : index
    %c0_86 = arith.constant 0 : index
    %c0_87 = arith.constant 0 : index
    %c0_88 = arith.constant 0 : index
    %110 = vector.load %arg4[%c1_85, %c0_86, %c0_87, %c0_88] : memref<2x9x1x512xf32, #tpu.memory_space<vmem>>, vector<1x1x1x512xf32>
    %111 = vector.shape_cast %110 : vector<1x1x1x512xf32> to vector<1x512xf32>
    %112 = vector.broadcast %111 : vector<1x512xf32> to vector<8x512xf32>
    %113 = arith.mulf %109, %112 : vector<8x512xf32>
    %c32_i32 = arith.constant 32 : i32
    %114 = tpu.dynamic_rotate %108 by %c32_i32 dim 1 : vector<8x512xf32>, i32 -> vector<8x512xf32>
    %c1_89 = arith.constant 1 : index
    %c1_90 = arith.constant 1 : index
    %c0_91 = arith.constant 0 : index
    %c0_92 = arith.constant 0 : index
    %115 = vector.load %arg4[%c1_89, %c1_90, %c0_91, %c0_92] : memref<2x9x1x512xf32, #tpu.memory_space<vmem>>, vector<1x1x1x512xf32>
    %116 = vector.shape_cast %115 : vector<1x1x1x512xf32> to vector<1x512xf32>
    %117 = vector.broadcast %116 : vector<1x512xf32> to vector<8x512xf32>
    %118 = arith.mulf %114, %117 : vector<8x512xf32>
    %c30_i32 = arith.constant 30 : i32
    %119 = tpu.dynamic_rotate %108 by %c30_i32 dim 1 : vector<8x512xf32>, i32 -> vector<8x512xf32>
    %c1_93 = arith.constant 1 : index
    %c2_94 = arith.constant 2 : index
    %c0_95 = arith.constant 0 : index
    %c0_96 = arith.constant 0 : index
    %120 = vector.load %arg4[%c1_93, %c2_94, %c0_95, %c0_96] : memref<2x9x1x512xf32, #tpu.memory_space<vmem>>, vector<1x1x1x512xf32>
    %121 = vector.shape_cast %120 : vector<1x1x1x512xf32> to vector<1x512xf32>
    %122 = vector.broadcast %121 : vector<1x512xf32> to vector<8x512xf32>
    %123 = arith.mulf %119, %122 : vector<8x512xf32>
    %c2_i32 = arith.constant 2 : i32
    %124 = tpu.dynamic_rotate %108 by %c2_i32 dim 1 : vector<8x512xf32>, i32 -> vector<8x512xf32>
    %c1_97 = arith.constant 1 : index
    %c3_98 = arith.constant 3 : index
    %c0_99 = arith.constant 0 : index
    %c0_100 = arith.constant 0 : index
    %125 = vector.load %arg4[%c1_97, %c3_98, %c0_99, %c0_100] : memref<2x9x1x512xf32, #tpu.memory_space<vmem>>, vector<1x1x1x512xf32>
    %126 = vector.shape_cast %125 : vector<1x1x1x512xf32> to vector<1x512xf32>
    %127 = vector.broadcast %126 : vector<1x512xf32> to vector<8x512xf32>
    %128 = arith.mulf %124, %127 : vector<8x512xf32>
    %c510_i32 = arith.constant 510 : i32
    %129 = tpu.dynamic_rotate %108 by %c510_i32 dim 1 : vector<8x512xf32>, i32 -> vector<8x512xf32>
    %c1_101 = arith.constant 1 : index
    %c5_102 = arith.constant 5 : index
    %c0_103 = arith.constant 0 : index
    %c0_104 = arith.constant 0 : index
    %130 = vector.load %arg4[%c1_101, %c5_102, %c0_103, %c0_104] : memref<2x9x1x512xf32, #tpu.memory_space<vmem>>, vector<1x1x1x512xf32>
    %131 = vector.shape_cast %130 : vector<1x1x1x512xf32> to vector<1x512xf32>
    %132 = vector.broadcast %131 : vector<1x512xf32> to vector<8x512xf32>
    %133 = arith.mulf %129, %132 : vector<8x512xf32>
    %c482_i32 = arith.constant 482 : i32
    %134 = tpu.dynamic_rotate %108 by %c482_i32 dim 1 : vector<8x512xf32>, i32 -> vector<8x512xf32>
    %c1_105 = arith.constant 1 : index
    %c6_106 = arith.constant 6 : index
    %c0_107 = arith.constant 0 : index
    %c0_108 = arith.constant 0 : index
    %135 = vector.load %arg4[%c1_105, %c6_106, %c0_107, %c0_108] : memref<2x9x1x512xf32, #tpu.memory_space<vmem>>, vector<1x1x1x512xf32>
    %136 = vector.shape_cast %135 : vector<1x1x1x512xf32> to vector<1x512xf32>
    %137 = vector.broadcast %136 : vector<1x512xf32> to vector<8x512xf32>
    %138 = arith.mulf %134, %137 : vector<8x512xf32>
    %c480_i32 = arith.constant 480 : i32
    %139 = tpu.dynamic_rotate %108 by %c480_i32 dim 1 : vector<8x512xf32>, i32 -> vector<8x512xf32>
    %c1_109 = arith.constant 1 : index
    %c7_110 = arith.constant 7 : index
    %c0_111 = arith.constant 0 : index
    %c0_112 = arith.constant 0 : index
    %140 = vector.load %arg4[%c1_109, %c7_110, %c0_111, %c0_112] : memref<2x9x1x512xf32, #tpu.memory_space<vmem>>, vector<1x1x1x512xf32>
    %141 = vector.shape_cast %140 : vector<1x1x1x512xf32> to vector<1x512xf32>
    %142 = vector.broadcast %141 : vector<1x512xf32> to vector<8x512xf32>
    %143 = arith.mulf %139, %142 : vector<8x512xf32>
    %c478_i32 = arith.constant 478 : i32
    %144 = tpu.dynamic_rotate %108 by %c478_i32 dim 1 : vector<8x512xf32>, i32 -> vector<8x512xf32>
    %c1_113 = arith.constant 1 : index
    %c8_114 = arith.constant 8 : index
    %c0_115 = arith.constant 0 : index
    %c0_116 = arith.constant 0 : index
    %145 = vector.load %arg4[%c1_113, %c8_114, %c0_115, %c0_116] : memref<2x9x1x512xf32, #tpu.memory_space<vmem>>, vector<1x1x1x512xf32>
    %146 = vector.shape_cast %145 : vector<1x1x1x512xf32> to vector<1x512xf32>
    %147 = vector.broadcast %146 : vector<1x512xf32> to vector<8x512xf32>
    %148 = arith.mulf %144, %147 : vector<8x512xf32>
    %149 = tpu.concatenate %113, %118, %123, %128, %108, %133, %138, %143, %148 in 0 : vector<8x512xf32>, vector<8x512xf32>, vector<8x512xf32>, vector<8x512xf32>, vector<8x512xf32>, vector<8x512xf32>, vector<8x512xf32>, vector<8x512xf32>, vector<8x512xf32> -> vector<72x512xf32>
    %150 = arith.truncf %149 : vector<72x512xf32> to vector<72x512xbf16>
    %c2_117 = arith.constant 2 : index
    %c0_118 = arith.constant 0 : index
    %c0_119 = arith.constant 0 : index
    %151 = vector.load %arg2[%c2_117, %c0_118, %c0_119] : memref<4x8x144xbf16, #tpu.memory_space<vmem>>, vector<1x8x144xbf16>
    %152 = vector.shape_cast %151 : vector<1x8x144xbf16> to vector<8x144xbf16>
    %153 = vector.extract_strided_slice %152 {offsets = [0, 0], sizes = [8, 72], strides = [1, 1]} : vector<8x144xbf16> to vector<8x72xbf16>
    %cst_120 = arith.constant dense<0.000000e+00> : vector<8x512xf32>
    %154 = tpu.matmul %153, %150, %cst_120 {dimension_numbers = #tpu.dot_dimension_numbers<[1], [0], [0], [1], [0, 0, 1, 1], [], []>} : vector<8x72xbf16>, vector<72x512xbf16>, vector<8x512xf32> -> vector<8x512xf32>
    %c2_121 = arith.constant 2 : index
    %c0_122 = arith.constant 0 : index
    %c0_123 = arith.constant 0 : index
    %155 = vector.load %arg3[%c2_121, %c0_122, %c0_123] : memref<4x8x1xf32, #tpu.memory_space<vmem>>, vector<1x8x1xf32>
    %156 = vector.shape_cast %155 : vector<1x8x1xf32> to vector<8x1xf32>
    %157 = vector.broadcast %156 : vector<8x1xf32> to vector<8x512xf32>
    %158 = arith.addf %154, %157 : vector<8x512xf32>
    %cst_124 = arith.constant 0.000000e+00 : f32
    %159 = vector.broadcast %cst_124 : f32 to vector<8x512xf32>
    %160 = arith.maximumf %158, %159 : vector<8x512xf32>
    %c17_i32_125 = arith.constant 17 : i32
    %161 = tpu.dynamic_rotate %108 by %c17_i32_125 dim 1 : vector<8x512xf32>, i32 -> vector<8x512xf32>
    %c0_126 = arith.constant 0 : index
    %c0_127 = arith.constant 0 : index
    %c0_128 = arith.constant 0 : index
    %c0_129 = arith.constant 0 : index
    %162 = vector.load %arg4[%c0_126, %c0_127, %c0_128, %c0_129] : memref<2x9x1x512xf32, #tpu.memory_space<vmem>>, vector<1x1x1x512xf32>
    %163 = vector.shape_cast %162 : vector<1x1x1x512xf32> to vector<1x512xf32>
    %164 = vector.broadcast %163 : vector<1x512xf32> to vector<8x512xf32>
    %165 = arith.mulf %161, %164 : vector<8x512xf32>
    %c16_i32_130 = arith.constant 16 : i32
    %166 = tpu.dynamic_rotate %108 by %c16_i32_130 dim 1 : vector<8x512xf32>, i32 -> vector<8x512xf32>
    %c0_131 = arith.constant 0 : index
    %c1_132 = arith.constant 1 : index
    %c0_133 = arith.constant 0 : index
    %c0_134 = arith.constant 0 : index
    %167 = vector.load %arg4[%c0_131, %c1_132, %c0_133, %c0_134] : memref<2x9x1x512xf32, #tpu.memory_space<vmem>>, vector<1x1x1x512xf32>
    %168 = vector.shape_cast %167 : vector<1x1x1x512xf32> to vector<1x512xf32>
    %169 = vector.broadcast %168 : vector<1x512xf32> to vector<8x512xf32>
    %170 = arith.mulf %166, %169 : vector<8x512xf32>
    %c15_i32_135 = arith.constant 15 : i32
    %171 = tpu.dynamic_rotate %108 by %c15_i32_135 dim 1 : vector<8x512xf32>, i32 -> vector<8x512xf32>
    %c0_136 = arith.constant 0 : index
    %c2_137 = arith.constant 2 : index
    %c0_138 = arith.constant 0 : index
    %c0_139 = arith.constant 0 : index
    %172 = vector.load %arg4[%c0_136, %c2_137, %c0_138, %c0_139] : memref<2x9x1x512xf32, #tpu.memory_space<vmem>>, vector<1x1x1x512xf32>
    %173 = vector.shape_cast %172 : vector<1x1x1x512xf32> to vector<1x512xf32>
    %174 = vector.broadcast %173 : vector<1x512xf32> to vector<8x512xf32>
    %175 = arith.mulf %171, %174 : vector<8x512xf32>
    %c1_i32_140 = arith.constant 1 : i32
    %176 = tpu.dynamic_rotate %108 by %c1_i32_140 dim 1 : vector<8x512xf32>, i32 -> vector<8x512xf32>
    %c0_141 = arith.constant 0 : index
    %c3_142 = arith.constant 3 : index
    %c0_143 = arith.constant 0 : index
    %c0_144 = arith.constant 0 : index
    %177 = vector.load %arg4[%c0_141, %c3_142, %c0_143, %c0_144] : memref<2x9x1x512xf32, #tpu.memory_space<vmem>>, vector<1x1x1x512xf32>
    %178 = vector.shape_cast %177 : vector<1x1x1x512xf32> to vector<1x512xf32>
    %179 = vector.broadcast %178 : vector<1x512xf32> to vector<8x512xf32>
    %180 = arith.mulf %176, %179 : vector<8x512xf32>
    %c511_i32_145 = arith.constant 511 : i32
    %181 = tpu.dynamic_rotate %108 by %c511_i32_145 dim 1 : vector<8x512xf32>, i32 -> vector<8x512xf32>
    %c0_146 = arith.constant 0 : index
    %c5_147 = arith.constant 5 : index
    %c0_148 = arith.constant 0 : index
    %c0_149 = arith.constant 0 : index
    %182 = vector.load %arg4[%c0_146, %c5_147, %c0_148, %c0_149] : memref<2x9x1x512xf32, #tpu.memory_space<vmem>>, vector<1x1x1x512xf32>
    %183 = vector.shape_cast %182 : vector<1x1x1x512xf32> to vector<1x512xf32>
    %184 = vector.broadcast %183 : vector<1x512xf32> to vector<8x512xf32>
    %185 = arith.mulf %181, %184 : vector<8x512xf32>
    %c497_i32_150 = arith.constant 497 : i32
    %186 = tpu.dynamic_rotate %108 by %c497_i32_150 dim 1 : vector<8x512xf32>, i32 -> vector<8x512xf32>
    %c0_151 = arith.constant 0 : index
    %c6_152 = arith.constant 6 : index
    %c0_153 = arith.constant 0 : index
    %c0_154 = arith.constant 0 : index
    %187 = vector.load %arg4[%c0_151, %c6_152, %c0_153, %c0_154] : memref<2x9x1x512xf32, #tpu.memory_space<vmem>>, vector<1x1x1x512xf32>
    %188 = vector.shape_cast %187 : vector<1x1x1x512xf32> to vector<1x512xf32>
    %189 = vector.broadcast %188 : vector<1x512xf32> to vector<8x512xf32>
    %190 = arith.mulf %186, %189 : vector<8x512xf32>
    %c496_i32_155 = arith.constant 496 : i32
    %191 = tpu.dynamic_rotate %108 by %c496_i32_155 dim 1 : vector<8x512xf32>, i32 -> vector<8x512xf32>
    %c0_156 = arith.constant 0 : index
    %c7_157 = arith.constant 7 : index
    %c0_158 = arith.constant 0 : index
    %c0_159 = arith.constant 0 : index
    %192 = vector.load %arg4[%c0_156, %c7_157, %c0_158, %c0_159] : memref<2x9x1x512xf32, #tpu.memory_space<vmem>>, vector<1x1x1x512xf32>
    %193 = vector.shape_cast %192 : vector<1x1x1x512xf32> to vector<1x512xf32>
    %194 = vector.broadcast %193 : vector<1x512xf32> to vector<8x512xf32>
    %195 = arith.mulf %191, %194 : vector<8x512xf32>
    %c495_i32_160 = arith.constant 495 : i32
    %196 = tpu.dynamic_rotate %108 by %c495_i32_160 dim 1 : vector<8x512xf32>, i32 -> vector<8x512xf32>
    %c0_161 = arith.constant 0 : index
    %c8_162 = arith.constant 8 : index
    %c0_163 = arith.constant 0 : index
    %c0_164 = arith.constant 0 : index
    %197 = vector.load %arg4[%c0_161, %c8_162, %c0_163, %c0_164] : memref<2x9x1x512xf32, #tpu.memory_space<vmem>>, vector<1x1x1x512xf32>
    %198 = vector.shape_cast %197 : vector<1x1x1x512xf32> to vector<1x512xf32>
    %199 = vector.broadcast %198 : vector<1x512xf32> to vector<8x512xf32>
    %200 = arith.mulf %196, %199 : vector<8x512xf32>
    %c17_i32_165 = arith.constant 17 : i32
    %201 = tpu.dynamic_rotate %160 by %c17_i32_165 dim 1 : vector<8x512xf32>, i32 -> vector<8x512xf32>
    %c0_166 = arith.constant 0 : index
    %c0_167 = arith.constant 0 : index
    %c0_168 = arith.constant 0 : index
    %c0_169 = arith.constant 0 : index
    %202 = vector.load %arg4[%c0_166, %c0_167, %c0_168, %c0_169] : memref<2x9x1x512xf32, #tpu.memory_space<vmem>>, vector<1x1x1x512xf32>
    %203 = vector.shape_cast %202 : vector<1x1x1x512xf32> to vector<1x512xf32>
    %204 = vector.broadcast %203 : vector<1x512xf32> to vector<8x512xf32>
    %205 = arith.mulf %201, %204 : vector<8x512xf32>
    %c16_i32_170 = arith.constant 16 : i32
    %206 = tpu.dynamic_rotate %160 by %c16_i32_170 dim 1 : vector<8x512xf32>, i32 -> vector<8x512xf32>
    %c0_171 = arith.constant 0 : index
    %c1_172 = arith.constant 1 : index
    %c0_173 = arith.constant 0 : index
    %c0_174 = arith.constant 0 : index
    %207 = vector.load %arg4[%c0_171, %c1_172, %c0_173, %c0_174] : memref<2x9x1x512xf32, #tpu.memory_space<vmem>>, vector<1x1x1x512xf32>
    %208 = vector.shape_cast %207 : vector<1x1x1x512xf32> to vector<1x512xf32>
    %209 = vector.broadcast %208 : vector<1x512xf32> to vector<8x512xf32>
    %210 = arith.mulf %206, %209 : vector<8x512xf32>
    %c15_i32_175 = arith.constant 15 : i32
    %211 = tpu.dynamic_rotate %160 by %c15_i32_175 dim 1 : vector<8x512xf32>, i32 -> vector<8x512xf32>
    %c0_176 = arith.constant 0 : index
    %c2_177 = arith.constant 2 : index
    %c0_178 = arith.constant 0 : index
    %c0_179 = arith.constant 0 : index
    %212 = vector.load %arg4[%c0_176, %c2_177, %c0_178, %c0_179] : memref<2x9x1x512xf32, #tpu.memory_space<vmem>>, vector<1x1x1x512xf32>
    %213 = vector.shape_cast %212 : vector<1x1x1x512xf32> to vector<1x512xf32>
    %214 = vector.broadcast %213 : vector<1x512xf32> to vector<8x512xf32>
    %215 = arith.mulf %211, %214 : vector<8x512xf32>
    %c1_i32_180 = arith.constant 1 : i32
    %216 = tpu.dynamic_rotate %160 by %c1_i32_180 dim 1 : vector<8x512xf32>, i32 -> vector<8x512xf32>
    %c0_181 = arith.constant 0 : index
    %c3_182 = arith.constant 3 : index
    %c0_183 = arith.constant 0 : index
    %c0_184 = arith.constant 0 : index
    %217 = vector.load %arg4[%c0_181, %c3_182, %c0_183, %c0_184] : memref<2x9x1x512xf32, #tpu.memory_space<vmem>>, vector<1x1x1x512xf32>
    %218 = vector.shape_cast %217 : vector<1x1x1x512xf32> to vector<1x512xf32>
    %219 = vector.broadcast %218 : vector<1x512xf32> to vector<8x512xf32>
    %220 = arith.mulf %216, %219 : vector<8x512xf32>
    %c511_i32_185 = arith.constant 511 : i32
    %221 = tpu.dynamic_rotate %160 by %c511_i32_185 dim 1 : vector<8x512xf32>, i32 -> vector<8x512xf32>
    %c0_186 = arith.constant 0 : index
    %c5_187 = arith.constant 5 : index
    %c0_188 = arith.constant 0 : index
    %c0_189 = arith.constant 0 : index
    %222 = vector.load %arg4[%c0_186, %c5_187, %c0_188, %c0_189] : memref<2x9x1x512xf32, #tpu.memory_space<vmem>>, vector<1x1x1x512xf32>
    %223 = vector.shape_cast %222 : vector<1x1x1x512xf32> to vector<1x512xf32>
    %224 = vector.broadcast %223 : vector<1x512xf32> to vector<8x512xf32>
    %225 = arith.mulf %221, %224 : vector<8x512xf32>
    %c497_i32_190 = arith.constant 497 : i32
    %226 = tpu.dynamic_rotate %160 by %c497_i32_190 dim 1 : vector<8x512xf32>, i32 -> vector<8x512xf32>
    %c0_191 = arith.constant 0 : index
    %c6_192 = arith.constant 6 : index
    %c0_193 = arith.constant 0 : index
    %c0_194 = arith.constant 0 : index
    %227 = vector.load %arg4[%c0_191, %c6_192, %c0_193, %c0_194] : memref<2x9x1x512xf32, #tpu.memory_space<vmem>>, vector<1x1x1x512xf32>
    %228 = vector.shape_cast %227 : vector<1x1x1x512xf32> to vector<1x512xf32>
    %229 = vector.broadcast %228 : vector<1x512xf32> to vector<8x512xf32>
    %230 = arith.mulf %226, %229 : vector<8x512xf32>
    %c496_i32_195 = arith.constant 496 : i32
    %231 = tpu.dynamic_rotate %160 by %c496_i32_195 dim 1 : vector<8x512xf32>, i32 -> vector<8x512xf32>
    %c0_196 = arith.constant 0 : index
    %c7_197 = arith.constant 7 : index
    %c0_198 = arith.constant 0 : index
    %c0_199 = arith.constant 0 : index
    %232 = vector.load %arg4[%c0_196, %c7_197, %c0_198, %c0_199] : memref<2x9x1x512xf32, #tpu.memory_space<vmem>>, vector<1x1x1x512xf32>
    %233 = vector.shape_cast %232 : vector<1x1x1x512xf32> to vector<1x512xf32>
    %234 = vector.broadcast %233 : vector<1x512xf32> to vector<8x512xf32>
    %235 = arith.mulf %231, %234 : vector<8x512xf32>
    %c495_i32_200 = arith.constant 495 : i32
    %236 = tpu.dynamic_rotate %160 by %c495_i32_200 dim 1 : vector<8x512xf32>, i32 -> vector<8x512xf32>
    %c0_201 = arith.constant 0 : index
    %c8_202 = arith.constant 8 : index
    %c0_203 = arith.constant 0 : index
    %c0_204 = arith.constant 0 : index
    %237 = vector.load %arg4[%c0_201, %c8_202, %c0_203, %c0_204] : memref<2x9x1x512xf32, #tpu.memory_space<vmem>>, vector<1x1x1x512xf32>
    %238 = vector.shape_cast %237 : vector<1x1x1x512xf32> to vector<1x512xf32>
    %239 = vector.broadcast %238 : vector<1x512xf32> to vector<8x512xf32>
    %240 = arith.mulf %236, %239 : vector<8x512xf32>
    %241 = tpu.concatenate %165, %170, %175, %180, %108, %185, %190, %195, %200, %205, %210, %215, %220, %160, %225, %230 in 0 : vector<8x512xf32>, vector<8x512xf32>, vector<8x512xf32>, vector<8x512xf32>, vector<8x512xf32>, vector<8x512xf32>, vector<8x512xf32>, vector<8x512xf32>, vector<8x512xf32>, vector<8x512xf32>, vector<8x512xf32>, vector<8x512xf32>, vector<8x512xf32>, vector<8x512xf32>, vector<8x512xf32>, vector<8x512xf32> -> vector<128x512xf32>
    %242 = tpu.concatenate %235, %240 in 0 : vector<8x512xf32>, vector<8x512xf32> -> vector<16x512xf32>
    %243 = tpu.concatenate %241, %242 in 0 : vector<128x512xf32>, vector<16x512xf32> -> vector<144x512xf32>
    %244 = arith.truncf %243 : vector<144x512xf32> to vector<144x512xbf16>
    %c3_205 = arith.constant 3 : index
    %c0_206 = arith.constant 0 : index
    %c0_207 = arith.constant 0 : index
    %245 = vector.load %arg2[%c3_205, %c0_206, %c0_207] : memref<4x8x144xbf16, #tpu.memory_space<vmem>>, vector<1x8x144xbf16>
    %246 = vector.shape_cast %245 : vector<1x8x144xbf16> to vector<8x144xbf16>
    %cst_208 = arith.constant dense<0.000000e+00> : vector<8x512xf32>
    %247 = tpu.matmul %246, %244, %cst_208 {dimension_numbers = #tpu.dot_dimension_numbers<[1], [0], [0], [1], [0, 0, 1, 1], [], []>} : vector<8x144xbf16>, vector<144x512xbf16>, vector<8x512xf32> -> vector<8x512xf32>
    %c3_209 = arith.constant 3 : index
    %c0_210 = arith.constant 0 : index
    %c0_211 = arith.constant 0 : index
    %248 = vector.load %arg3[%c3_209, %c0_210, %c0_211] : memref<4x8x1xf32, #tpu.memory_space<vmem>>, vector<1x8x1xf32>
    %249 = vector.shape_cast %248 : vector<1x8x1xf32> to vector<8x1xf32>
    %250 = vector.broadcast %249 : vector<8x1xf32> to vector<8x512xf32>
    %251 = arith.addf %247, %250 : vector<8x512xf32>
    %cst_212 = arith.constant 0.000000e+00 : f32
    %252 = vector.broadcast %cst_212 : f32 to vector<8x512xf32>
    %253 = arith.maximumf %251, %252 : vector<8x512xf32>
    %254 = arith.addf %253, %56 : vector<8x512xf32>
    %255 = vector.extract_strided_slice %254 {offsets = [0, 0], sizes = [4, 256], strides = [1, 1]} : vector<8x512xf32> to vector<4x256xf32>
    %c0_213 = arith.constant 0 : index
    %c0_214 = arith.constant 0 : index
    %c0_215 = arith.constant 0 : index
    %256 = vector.load %arg5[%c0_213, %c0_214, %c0_215] : memref<2x4x256xf32, #tpu.memory_space<vmem>>, vector<1x4x256xf32>
    %257 = vector.shape_cast %256 : vector<1x4x256xf32> to vector<4x256xf32>
    %258 = vector.shape_cast %255 : vector<4x256xf32> to vector<1x4x256xf32>
    tpu.vector_store %arg5[%c0_213, %c0_214, %c0_215], %258 {strides = array<i32>} : memref<2x4x256xf32, #tpu.memory_space<vmem>>, vector<1x4x256xf32>,
    %259 = vector.extract_strided_slice %254 {offsets = [0, 256], sizes = [4, 256], strides = [1, 1]} : vector<8x512xf32> to vector<4x256xf32>
    %c1_216 = arith.constant 1 : index
    %c0_217 = arith.constant 0 : index
    %c0_218 = arith.constant 0 : index
    %260 = vector.load %arg5[%c1_216, %c0_217, %c0_218] : memref<2x4x256xf32, #tpu.memory_space<vmem>>, vector<1x4x256xf32>
    %261 = vector.shape_cast %260 : vector<1x4x256xf32> to vector<4x256xf32>
    %262 = vector.shape_cast %259 : vector<4x256xf32> to vector<1x4x256xf32>
    tpu.vector_store %arg5[%c1_216, %c0_217, %c0_218], %262 {strides = array<i32>} : memref<2x4x256xf32, #tpu.memory_space<vmem>>, vector<1x4x256xf32>,
    return
  }
  func.func @transform_0(%arg0: i32) -> (i32, i32, i32) {
    %c0_i32 = arith.constant 0 : i32
    %c0_i32_0 = arith.constant 0 : i32
    %c0_i32_1 = arith.constant 0 : i32
    %c0_i32_2 = arith.constant 0 : i32
    return %c0_i32, %c0_i32_0, %c0_i32_1 : i32, i32, i32
  }
  func.func @transform_1(%arg0: i32) -> (i32, i32, i32) {
    %c0_i32 = arith.constant 0 : i32
    %c0_i32_0 = arith.constant 0 : i32
    %c0_i32_1 = arith.constant 0 : i32
    %c0_i32_2 = arith.constant 0 : i32
    return %c0_i32, %c0_i32_0, %c0_i32_1 : i32, i32, i32
  }
  func.func @transform_2(%arg0: i32) -> (i32, i32, i32) {
    %c0_i32 = arith.constant 0 : i32
    %c0_i32_0 = arith.constant 0 : i32
    %c0_i32_1 = arith.constant 0 : i32
    %c0_i32_2 = arith.constant 0 : i32
    return %c0_i32, %c0_i32_0, %c0_i32_1 : i32, i32, i32
  }
  func.func @transform_3(%arg0: i32) -> (i32, i32, i32, i32) {
    %c0_i32 = arith.constant 0 : i32
    %c0_i32_0 = arith.constant 0 : i32
    %c0_i32_1 = arith.constant 0 : i32
    %c0_i32_2 = arith.constant 0 : i32
    %c0_i32_3 = arith.constant 0 : i32
    return %c0_i32, %c0_i32_0, %c0_i32_1, %c0_i32_2 : i32, i32, i32, i32
  }
  func.func @transform_4(%arg0: i32) -> (i32, i32, i32) {
    %c0_i32 = arith.constant 0 : i32
    %c0_i32_0 = arith.constant 0 : i32
    %c0_i32_1 = arith.constant 0 : i32
    %c0_i32_2 = arith.constant 0 : i32
    return %c0_i32, %c0_i32_0, %c0_i32_1 : i32, i32, i32
  }
}

</mosaic_0001>

<bundles_post_ra>
// kernel: rsu2_forward.1
= control target key start
LH: loop header
LB: loop body
LE: loop exit
PB: predicated region body
PF: predicated region fallthrough
CT: control target
= control target key end

     0   :  { %s1659_s19 = smov 17   ;;  %s1660_s24 = smov 16   ;;  %v1666_v4 = vmov 0   ;;  %v31_v6 = vlaneseq  ;;  %vm375_vm8 = vcmask 1043456   ;;  %vm371_vm9 = vcmask 588800   ;;  %s2775_s0 = inlined_call_operand.vmem [shape: f32[2,8,256], index: 0, kind: input, shape index: {}]   ;;  %s2776_s2 = inlined_call_operand.vmem [shape: f32[4,8,1], index: 2, kind: input, shape index: {}]   ;;  %s2777_s3 = inlined_call_operand.vmem [shape: f32[2,9,1,512], index: 3, kind: input, shape index: {}]   ;;  %s2778_s1 = inlined_call_operand.vmem [shape: bf16[4,8,144], index: 1, kind: input, shape index: {}]   ;;  %s2779_s4 = inlined_call_operand.vmem [shape: f32[2,4,256], index: 4, kind: output, shape index: {}]  }
   0x1   :  { %v1704_v0 = vld [vmem:[%s2775_s0 + $0x10] sm:$0xff]  ;;  %v1709_v1 = vld [vmem:[%s2775_s0] sm:$0xff]  ;;  %v1718_v2 = vld [vmem:[%s2775_s0 + $0x18] sm:$0xff]  ;;  %s1662_s25 = smov 1   ;;  %s1663_s26 = smov 127   ;;  %420 = vmatprep.mubr.bf16.mxu0 %v1666_v4  ;;  %461 = vmatprep.mubr.bf16.mxu1 %v1666_v4 }
   0x2   :  { %27 = vrot.lane.b32.xlu1 %v1704_v0, %s1659_s19  ;;  %23 = vrot.lane.b32.xlu0 %v1709_v1, %s1659_s19  ;;  %v1723_v3 = vld [vmem:[%s2775_s0 + $0x8] sm:$0xff]  ;;  %s1661_s0 = smov 15   ;;  %s1664_s27 = smov 113   ;;  %v365_v5 = vld [vmem:[%s2776_s2] sm:$0xff]  ;;  %v41_v7 = vshrl.u32 %v31_v6, 7  ;;  %v1792_v10 = vand.u32 127, %v31_v6 }
   0x3   :  { %s1665_s28 = smov 112   ;;  %1655 = vset.pattern.permute.xlu0 %v1666_v4  ;;  %1656 = vset.pattern.permute.xlu1 %v1666_v4  ;;  %s1667_s29 = smov 111   ;;  %v38_v12 = vld [vmem:[%s2777_s3] sm:$0xf]  ;;  %v1600_v13 = vld [vmem:[%s2777_s3 + $0x4] sm:$0xf] }
   0x4   :  { %v1794_v11 = vsub.s32 1, %v41_v7  ;;  %vm33_vm0 = vcmp.lt.s32.totalorder %v1792_v10, 17  ;;  %v1803_v16 = vsub.s32 0, %v41_v7  ;;  %v1805_v17 = vsub.s32 3, %v41_v7  ;;  %v1601_v53 = vld [vmem:[%s2777_s3 + $0x8] sm:$0xf] }
   0x5   :  { %v1807_v18 = vsub.s32 2, %v41_v7  ;;  %vm72_vm1 = vcmp.lt.s32.totalorder %v1792_v10, 16  ;;  %v1602_v54 = vld [vmem:[%s2777_s3 + $0xc] sm:$0xf]  ;;  %vm112_vm2 = vcmp.lt.s32.totalorder %v1792_v10, 15  ;;  %vm152_vm3 = vcmp.lt.s32.totalorder %v1792_v10, 1 }
   0x6   :  { %29 = vrot.lane.b32.xlu1 %v1718_v2, %s1659_s19  ;;  %25 = vrot.lane.b32.xlu0 %v1723_v3, %s1659_s19  ;;  %v1811_v19 = vrot.slane %v38_v12, %v1794_v11  ;;  %v1814_v20 = vrot.slane %v1600_v13, %v1794_v11  ;;  %v1819_v24 = vrot.slane %v38_v12, %v1803_v16  ;;  %vm192_vm4 = vcmp.lt.s32.totalorder %v1792_v10, 127  ;;  %s1668_s9 = smov 34   ;;  %s1669_s10 = smov 32  }
   0x7   :  { %v1822_v25 = vrot.slane %v1600_v13, %v1803_v16  ;;  %v1825_v26 = vrot.slane %v38_v12, %v1805_v17  ;;  %v1832_v29 = vrot.slane %v1600_v13, %v1805_v17  ;;  %v1835_v30 = vrot.slane %v38_v12, %v1807_v18  ;;  %s1670_s11 = smov 30   ;;  %s1671_s12 = smov 2  }
   0x8   :  { %v1842_v34 = vrot.slane %v1600_v13, %v1807_v18  ;;  %v1866_v57 = vrot.slane %v1601_v53, %v1794_v11  ;;  %v1870_v58 = vrot.slane %v1602_v54, %v1794_v11  ;;  %v1875_v60 = vrot.slane %v1601_v53, %v1803_v16  ;;  %s1672_s13 = smov 126   ;;  %s1673_s14 = smov 98  }
   0x9   :  { %v1878_v61 = vrot.slane %v1601_v53, %v1807_v18  ;;  %v1881_v62 = vrot.slane %v1601_v53, %v1805_v17  ;;  %vm272_vm5 = vcmp.lt.s32.totalorder %v1792_v10, 112  ;;  %vm232_vm6 = vcmp.lt.s32.totalorder %v1792_v10, 113  ;;  %s1674_s15 = smov 96   ;;  %s1675_s16 = smov 94  }
   0xa   :  { %66 = vrot.lane.b32.xlu1 %v1723_v3, %s1660_s24  ;;  %64 = vrot.lane.b32.xlu0 %v1709_v1, %s1660_s24  ;;  %vm312_vm7 = vcmp.lt.s32.totalorder %v1792_v10, 111  ;;  %vm740_vm10 = vcmp.lt.s32.totalorder %v1792_v10, 34  ;;  %vm780_vm11 = vcmp.lt.s32.totalorder %v1792_v10, 32  ;;  %vm820_vm12 = vcmp.lt.s32.totalorder %v1792_v10, 30 }
   0xb   :  { %vm860_vm13 = vcmp.lt.s32.totalorder %v1792_v10, 2  ;;  %vm900_vm14 = vcmp.lt.s32.totalorder %v1792_v10, 126  ;;  %vm940_vm15 = vcmp.lt.s32.totalorder %v1792_v10, 98 }
   0xe   :  { %70 = vrot.lane.b32.xlu1 %v1718_v2, %s1660_s24  ;;  %68 = vrot.lane.b32.xlu0 %v1704_v0, %s1660_s24 }
  0x12   :  { %106 = vrot.lane.b32.xlu1 %v1723_v3, %s1661_s0  ;;  %104 = vrot.lane.b32.xlu0 %v1709_v1, %s1661_s0 }
  0x16   :  { %110 = vrot.lane.b32.xlu1 %v1718_v2, %s1661_s0  ;;  %108 = vrot.lane.b32.xlu0 %v1704_v0, %s1661_s0 }
  0x1a   :  { %146 = vrot.lane.b32.xlu1 %v1723_v3, %s1662_s25  ;;  %144 = vrot.lane.b32.xlu0 %v1709_v1, %s1662_s25 }
  0x1e   :  { %150 = vrot.lane.b32.xlu1 %v1718_v2, %s1662_s25  ;;  %148 = vrot.lane.b32.xlu0 %v1704_v0, %s1662_s25 }
  0x22   :  { %186 = vrot.lane.b32.xlu1 %v1723_v3, %s1663_s26  ;;  %184 = vrot.lane.b32.xlu0 %v1709_v1, %s1663_s26 }
  0x26   :  { %190 = vrot.lane.b32.xlu1 %v1718_v2, %s1663_s26  ;;  %188 = vrot.lane.b32.xlu0 %v1704_v0, %s1663_s26 }
  0x2a   :  { %226 = vrot.lane.b32.xlu1 %v1723_v3, %s1664_s27  ;;  %224 = vrot.lane.b32.xlu0 %v1709_v1, %s1664_s27 }
  0x2e   :  { %230 = vrot.lane.b32.xlu1 %v1718_v2, %s1664_s27  ;;  %228 = vrot.lane.b32.xlu0 %v1704_v0, %s1664_s27 }
  0x32   :  { %266 = vrot.lane.b32.xlu1 %v1723_v3, %s1665_s28  ;;  %264 = vrot.lane.b32.xlu0 %v1709_v1, %s1665_s28 }
  0x36   :  { %270 = vrot.lane.b32.xlu1 %v1718_v2, %s1665_s28  ;;  %268 = vrot.lane.b32.xlu0 %v1704_v0, %s1665_s28 }
  0x3a   :  { %306 = vrot.lane.b32.xlu1 %v1723_v3, %s1667_s29  ;;  %304 = vrot.lane.b32.xlu0 %v1709_v1, %s1667_s29 }
  0x3e   :  { %310 = vrot.lane.b32.xlu1 %v1718_v2, %s1667_s29  ;;  %308 = vrot.lane.b32.xlu0 %v1704_v0, %s1667_s29 }
  0x42   :  { %368 = vperm.xlu0 %1655, %v365_v5  }
  0x74   :  { %v28_v8 = vpop.permute.xlu1 %27  ;;  %v24_v9 = vpop.permute.xlu0 %23 }
  0x78   :  { %v30_v14 = vpop.permute.xlu1 %29  ;;  %v26_v15 = vpop.permute.xlu0 %25 }
  0x79   :  { %v36_v21 = vsel %vm33_vm0, %v24_v9, %v26_v15  ;;  %v37_v27 = vsel %vm33_vm0, %v30_v14, %v24_v9  ;;  %v34_v33 = vsel %vm33_vm0, %v28_v8, %v30_v14  ;;  %v35_v35 = vsel %vm33_vm0, %v26_v15, %v28_v8 }
  0x7a   :  { %v61_v31 = vmul.f32 %v1811_v19, %v36_v21  ;;  %v60_v39 = vmul.f32 %v1819_v24, %v37_v27  ;;  %v63_v42 = vmul.f32 %v1825_v26, %v34_v33  ;;  %v62_v46 = vmul.f32 %v1835_v30, %v35_v35 }
  0x7b   :  { %v1888_v8 = vrot.slane %v1602_v54, %v1803_v16  ;;  %v1891_v9 = vrot.slane %v1602_v54, %v1807_v18  ;;  %v1898_v15 = vrot.slane %v1602_v54, %v1805_v17 }
  0x7c   :  { %v67_v22 = vpop.permute.xlu1 %66  ;;  %v65_v23 = vpop.permute.xlu0 %64 }
  0x7d   :  { %v75_v28 = vsel %vm72_vm1, %v65_v23, %v67_v22 }
  0x7e   :  { %v101_v32 = vmul.f32 %v1814_v20, %v75_v28 }
  0x80   :  { %v71_v36 = vpop.permute.xlu1 %70  ;;  %v69_v37 = vpop.permute.xlu0 %68  ;;  %v345_v38 = vpack.c.bf16 %v101_v32, %v61_v31 }
  0x81   :  { %v76_v40 = vsel %vm72_vm1, %v71_v36, %v65_v23  ;;  %v74_v41 = vsel %vm72_vm1, %v67_v22, %v69_v37  ;;  %v73_v43 = vsel %vm72_vm1, %v69_v37, %v71_v36 }
  0x82   :  { %388 = vmatprep.subr.bf16.mxu0 %v345_v38  ;;  %v100_v44 = vmul.f32 %v1822_v25, %v76_v40  ;;  %v103_v45 = vmul.f32 %v1832_v29, %v73_v43  ;;  %v102_v47 = vmul.f32 %v1842_v34, %v74_v41  ;;  %v1603_v40 = vld [vmem:[%s2777_s3 + $0x14] sm:$0xf] }
  0x84   :  { %v107_v48 = vpop.permute.xlu1 %106  ;;  %v105_v49 = vpop.permute.xlu0 %104  ;;  %v344_v50 = vpack.c.bf16 %v100_v44, %v60_v39  ;;  %v347_v51 = vpack.c.bf16 %v103_v45, %v63_v42  ;;  %v346_v52 = vpack.c.bf16 %v102_v47, %v62_v46  ;;  %v1919_v46 = vrot.slane %v1603_v40, %v1803_v16 }
  0x85   :  { %v115_v59 = vsel %vm112_vm2, %v105_v49, %v107_v48  ;;  %v1922_v47 = vrot.slane %v1603_v40, %v1805_v17 }
  0x86   :  { %389 = vmatpush1.bf16.msra.mxu0 %v344_v50  ;;  %429 = vmatprep.subr.bf16.mxu1 %v347_v51  ;;  %v141_v12 = vmul.f32 %v1866_v57, %v115_v59  ;;  %v1930_v50 = vrot.slane %v1603_v40, %v1807_v18 }
  0x87   :  { %430 = vmatpush1.bf16.msra.mxu1 %v346_v52 }
  0x88   :  { %v111_v55 = vpop.permute.xlu1 %110  ;;  %v109_v56 = vpop.permute.xlu0 %108 }
  0x89   :  { %v116_v6 = vsel %vm112_vm2, %v111_v55, %v105_v49  ;;  %v114_v13 = vsel %vm112_vm2, %v107_v48, %v109_v56  ;;  %v113_v21 = vsel %vm112_vm2, %v109_v56, %v111_v55  ;;  %v1927_v49 = vrot.slane %v1603_v40, %v1794_v11 }
  0x8a   :  { %v140_v22 = vmul.f32 %v1875_v60, %v116_v6  ;;  %v142_v31 = vmul.f32 %v1878_v61, %v114_v13  ;;  %v143_v36 = vmul.f32 %v1881_v62, %v113_v21 }
  0x8c   :  { %v147_v63 = vpop.permute.xlu1 %146  ;;  %v145_v5 = vpop.permute.xlu0 %144 }
  0x8d   :  { %v155_v7 = vsel %vm152_vm3, %v145_v5, %v147_v63 }
  0x8e   :  { %v181_v14 = vmul.f32 %v1870_v58, %v155_v7 }
  0x90   :  { %v151_v23 = vpop.permute.xlu1 %150  ;;  %v149_v27 = vpop.permute.xlu0 %148  ;;  %v349_v28 = vpack.c.bf16 %v181_v14, %v141_v12 }
  0x91   :  { %v156_v32 = vsel %vm152_vm3, %v151_v23, %v145_v5  ;;  %v153_v33 = vsel %vm152_vm3, %v149_v27, %v151_v23  ;;  %v154_v35 = vsel %vm152_vm3, %v147_v63, %v149_v27  ;;  %v1605_v27 = vld [vmem:[%s2777_s3 + $0x1c] sm:$0xf] }
  0x92   :  { %v180_v37 = vmul.f32 %v1888_v8, %v156_v32  ;;  %v182_v38 = vmul.f32 %v1891_v9, %v154_v35  ;;  %v183_v39 = vmul.f32 %v1898_v15, %v153_v33  ;;  %390 = vmatprep.subr.bf16.mxu0 %v349_v28  ;;  %v1968_v35 = vrot.slane %v1605_v27, %v1803_v16 }
  0x93   :  { %v1982_v40 = vrot.slane %v1605_v27, %v1807_v18 }
  0x94   :  { %v187_v41 = vpop.permute.xlu1 %186  ;;  %v185_v42 = vpop.permute.xlu0 %184  ;;  %v348_v43 = vpack.c.bf16 %v180_v37, %v140_v22  ;;  %v351_v44 = vpack.c.bf16 %v183_v39, %v143_v36  ;;  %v350_v45 = vpack.c.bf16 %v182_v38, %v142_v31  ;;  %v1606_v36 = vld [vmem:[%s2777_s3 + $0x20] sm:$0xf]  ;;  %v1976_v38 = vrot.slane %v1605_v27, %v1805_v17 }
  0x95   :  { %v195_v48 = vsel %vm192_vm4, %v185_v42, %v187_v41  ;;  %v1979_v39 = vrot.slane %v1605_v27, %v1794_v11  ;;  %2803 = vst [vmem:[#allocation5_spill] sm:$0xff] %v1982_v40 }
  0x96   :  { %391 = vmatpush1.bf16.msra.mxu0 %v348_v43  ;;  %431 = vmatprep.subr.bf16.mxu1 %v351_v44  ;;  %v220_v53 = vmul.f32 %v1919_v46, %v195_v48  ;;  %2802 = vst [vmem:[#allocation4_spill] sm:$0xff] %v1976_v38 }
  0x97   :  { %432 = vmatpush1.bf16.msra.mxu1 %v350_v45 }
  0x98   :  { %v191_v51 = vpop.permute.xlu1 %190  ;;  %v189_v52 = vpop.permute.xlu0 %188  ;;  %v352_v21 = vpack.c.bf16 %v220_v53, %v1709_v1 }
  0x99   :  { %v196_v54 = vsel %vm192_vm4, %v191_v51, %v185_v42  ;;  %v193_v55 = vsel %vm192_vm4, %v189_v52, %v191_v51  ;;  %v194_v56 = vsel %vm192_vm4, %v187_v41, %v189_v52  ;;  %v1995_v52 = vrot.slane %v1606_v36, %v1803_v16 }
  0x9a   :  { %v223_v59 = vmul.f32 %v1922_v47, %v196_v54  ;;  %v221_v63 = vmul.f32 %v1927_v49, %v194_v56  ;;  %v222_v5 = vmul.f32 %v1930_v50, %v193_v55 }
  0x9b   :  { %2804 = vst [vmem:[#allocation6_spill] sm:$0xff] %v1995_v52 }
  0x9c   :  { %v227_v6 = vpop.permute.xlu1 %226  ;;  %v225_v7 = vpop.permute.xlu0 %224  ;;  %v353_v12 = vpack.c.bf16 %v221_v63, %v1723_v3  ;;  %v355_v13 = vpack.c.bf16 %v223_v59, %v1718_v2  ;;  %v354_v14 = vpack.c.bf16 %v222_v5, %v1704_v0  ;;  %v1604_v3 = vld [vmem:[%s2777_s3 + $0x18] sm:$0xf] }
  0x9d   :  { %v1955_v0 = vrot.slane %v1604_v3, %v1805_v17  ;;  %v1958_v1 = vrot.slane %v1604_v3, %v1794_v11  ;;  %v1963_v32 = vrot.slane %v1604_v3, %v1807_v18  ;;  %v1985_v41 = vrot.slane %v1604_v3, %v1803_v16 }
  0x9e   :  { %392 = vmatprep.subr.bf16.mxu0 %v353_v12  ;;  %433 = vmatprep.subr.bf16.mxu1 %v355_v13  ;;  %v235_v43 = vsel %vm232_vm6, %v225_v7, %v227_v6  ;;  %v2012_v3 = vrot.slane %v1606_v36, %v1805_v17 }
  0x9f   :  { %393 = vmatpush1.bf16.msra.mxu0 %v352_v21  ;;  %434 = vmatpush1.bf16.msra.mxu1 %v354_v14  ;;  %2800 = vst [vmem:[#allocation2_spill] sm:$0xff] %v1955_v0  ;;  %2801 = vst [vmem:[#allocation3_spill] sm:$0xff] %v1963_v32 }
  0xa0   :  { %v231_v22 = vpop.permute.xlu1 %230  ;;  %v229_v23 = vpop.permute.xlu0 %228  ;;  %2805 = vst [vmem:[#allocation7_spill] sm:$0xff] %v2012_v3 }
  0xa1   :  { %v236_v31 = vsel %vm232_vm6, %v231_v22, %v225_v7  ;;  %v234_v33 = vsel %vm232_vm6, %v227_v6, %v229_v23  ;;  %v233_v42 = vsel %vm232_vm6, %v229_v23, %v231_v22  ;;  %v260_v7 = vmul.f32 %v1985_v41, %v235_v43 }
  0xa2   :  { %v263_v44 = vmul.f32 %v1955_v0, %v236_v31  ;;  %v261_v45 = vmul.f32 %v1958_v1, %v234_v33  ;;  %v262_v59 = vmul.f32 %v1963_v32, %v233_v42  ;;  %v2019_v31 = vrot.slane %v1606_v36, %v1807_v18 }
  0xa4   :  { %v267_v2 = vpop.permute.xlu1 %266  ;;  %v265_v28 = vpop.permute.xlu0 %264  ;;  %2807 = vst [vmem:[#allocation9_spill] sm:$0xff] %v2019_v31 }
  0xa5   :  { %v275_v37 = vsel %vm272_vm5, %v265_v28, %v267_v2 }
  0xa6   :  { %v300_v53 = vmul.f32 %v1968_v35, %v275_v37 }
  0xa8   :  { %v271_v48 = vpop.permute.xlu1 %270  ;;  %v269_v51 = vpop.permute.xlu0 %268  ;;  %v356_v27 = vpack.c.bf16 %v300_v53, %v260_v7 }
  0xa9   :  { %v276_v54 = vsel %vm272_vm5, %v271_v48, %v265_v28  ;;  %v273_v55 = vsel %vm272_vm5, %v269_v51, %v271_v48  ;;  %v274_v56 = vsel %vm272_vm5, %v267_v2, %v269_v51  ;;  %v2015_v2 = vrot.slane %v1606_v36, %v1794_v11 }
  0xaa   :  { %v303_v63 = vmul.f32 %v1976_v38, %v276_v54  ;;  %v301_v5 = vmul.f32 %v1979_v39, %v274_v56  ;;  %v302_v6 = vmul.f32 %v1982_v40, %v273_v55 }
  0xab   :  { %2806 = vst [vmem:[#allocation8_spill] sm:$0xff] %v2015_v2 }
  0xac   :  { %v307_v12 = vpop.permute.xlu1 %306  ;;  %v305_v13 = vpop.permute.xlu0 %304  ;;  %v357_v14 = vpack.c.bf16 %v301_v5, %v261_v45  ;;  %v359_v21 = vpack.c.bf16 %v303_v63, %v263_v44  ;;  %v358_v22 = vpack.c.bf16 %v302_v6, %v262_v59  ;;  %v364_v63 = vld [vmem:[%s2778_s1] sm:$0xff] }
  0xad   :  { %v315_v23 = vsel %vm312_vm7, %v305_v13, %v307_v12 }
  0xae   :  { %394 = vmatprep.subr.bf16.mxu0 %v357_v14  ;;  %435 = vmatprep.subr.bf16.mxu1 %v359_v21  ;;  %v340_v28 = vmul.f32 %v1995_v52, %v315_v23 }
  0xaf   :  { %395 = vmatpush1.bf16.msra.mxu0 %v356_v27  ;;  %436 = vmatpush1.bf16.msra.mxu1 %v358_v22 }
  0xb0   :  { %v311_v33 = vpop.permute.xlu1 %310  ;;  %v309_v37 = vpop.permute.xlu0 %308  ;;  %v360_v51 = vpack.c.bf16 %v340_v28, %v340_v28 }
  0xb1   :  { %v316_v42 = vsel %vm312_vm7, %v311_v33, %v305_v13  ;;  %v313_v43 = vsel %vm312_vm7, %v309_v37, %v311_v33  ;;  %v314_v44 = vsel %vm312_vm7, %v307_v12, %v309_v37 }
  0xb2   :  { %v343_v45 = vmul.f32 %v2012_v3, %v316_v42  ;;  %v341_v48 = vmul.f32 %v2015_v2, %v314_v44  ;;  %v342_v36 = vmul.f32 %v2019_v31, %v313_v43  ;;  %v377_v56 = vsel %vm375_vm8, %v360_v51, 0 }
  0xb4   :  { %v363_v53 = vpack.c.bf16 %v343_v45, %v343_v45  ;;  %v361_v54 = vpack.c.bf16 %v341_v48, %v341_v48  ;;  %v362_v55 = vpack.c.bf16 %v342_v36, %v342_v36  ;;  %v1612_v48 = vld [vmem:[%s2776_s2 + $0x8] sm:$0xff] }
  0xb6   :  { %1607 = vmatprep.subr.msk.bf16.mxu0 %vm375_vm8, %v361_v54  ;;  %1609 = vmatprep.subr.msk.bf16.mxu1 %vm375_vm8, %v363_v53  ;;  %v383_v59 = vsel %vm375_vm8, %v362_v55, 0 }
  0xb7   :  { %397 = vmatpush1.bf16.msra.mxu0 %v377_v56  ;;  %438 = vmatpush1.bf16.msra.mxu1 %v383_v59 }
  0xba   :  { %1608 = vmatmul.mubr.msk.bf16.vlgmr.msra.gmra.mrb[0].mxu0 %vm371_vm9, %v364_v63  ;;  %1610 = vmatmul.mubr.msk.bf16.vlgmr.msra.gmra.mrb[0].mxu1 %vm371_vm9, %v364_v63 }
  0xbb   :  { %678 = vmatprep.mubr.bf16.mxu0 %v1666_v4  ;;  %719 = vmatprep.mubr.bf16.mxu1 %v1666_v4 }
  0xc1   :  { %v369_v5 = vpop.permute.xlu0 %368 }
 0x18d   :  { %v422_v6 = vpop.f32.mrb[0].mxu0  ;;  %v463_v7 = vpop.f32.mrb[0].mxu1 }
 0x18e   :  { %v423_v12 = vadd.f32 %v422_v6, %v369_v5  ;;  %v464_v13 = vadd.f32 %v463_v7, %v369_v5  ;;  %v424_v14 = vpop.f32.mrb[1].mxu0  ;;  %v465_v21 = vpop.f32.mrb[1].mxu1 }
 0x18f   :  { %v426_v22 = vpop.f32.mrb[2].mxu0  ;;  %v467_v23 = vpop.f32.mrb[2].mxu1  ;;  %v425_v33 = vadd.f32 %v424_v14, %v369_v5  ;;  %v466_v44 = vadd.f32 %v465_v21, %v369_v5 }
 0x190   :  { %v2041_v27 = vmax.f32 %v423_v12, 0.0  ;;  %v2043_v28 = vmax.f32 %v464_v13, 0.0  ;;  %v427_v37 = vpop.f32.mrb[3].mxu0  ;;  %v468_v42 = vpop.f32.mrb[3].mxu1 }
 0x191   :  { %v2049_v43 = vmax.f32 %v425_v33, 0.0  ;;  %v2055_v45 = vmax.f32 %v466_v44, 0.0 }
 0x192   :  { %2808 = vst [vmem:[#allocation10_spill] sm:$0xff] %v2041_v27  ;;  %2809 = vst [vmem:[#allocation11_spill] sm:$0xff] %v2043_v28  ;;  %478 = vrot.lane.b32.xlu0 %v2043_v28, %s1659_s19  ;;  %474 = vrot.lane.b32.xlu1 %v2041_v27, %s1659_s19 }
 0x193   :  { %2810 = vst [vmem:[#allocation12_spill] sm:$0xff] %v2049_v43  ;;  %2811 = vst [vmem:[#allocation13_spill] sm:$0xff] %v2055_v45 }
 0x196   :  { %490 = vrot.lane.b32.xlu0 %v2041_v27, %s1660_s24  ;;  %476 = vrot.lane.b32.xlu1 %v2049_v43, %s1659_s19 }
 0x19a   :  { %494 = vrot.lane.b32.xlu0 %v2043_v28, %s1660_s24  ;;  %480 = vrot.lane.b32.xlu1 %v2055_v45, %s1659_s19 }
 0x19e   :  { %506 = vrot.lane.b32.xlu0 %v2041_v27, %s1661_s0  ;;  %492 = vrot.lane.b32.xlu1 %v2049_v43, %s1660_s24 }
 0x1a2   :  { %510 = vrot.lane.b32.xlu0 %v2043_v28, %s1661_s0  ;;  %496 = vrot.lane.b32.xlu1 %v2055_v45, %s1660_s24 }
 0x1a6   :  { %522 = vrot.lane.b32.xlu0 %v2041_v27, %s1662_s25  ;;  %508 = vrot.lane.b32.xlu1 %v2049_v43, %s1661_s0 }
 0x1aa   :  { %526 = vrot.lane.b32.xlu0 %v2043_v28, %s1662_s25  ;;  %512 = vrot.lane.b32.xlu1 %v2055_v45, %s1661_s0 }
 0x1ae   :  { %538 = vrot.lane.b32.xlu0 %v2041_v27, %s1663_s26  ;;  %524 = vrot.lane.b32.xlu1 %v2049_v43, %s1662_s25 }
 0x1b2   :  { %542 = vrot.lane.b32.xlu0 %v2043_v28, %s1663_s26  ;;  %528 = vrot.lane.b32.xlu1 %v2055_v45, %s1662_s25 }
 0x1b6   :  { %554 = vrot.lane.b32.xlu0 %v2041_v27, %s1664_s27  ;;  %540 = vrot.lane.b32.xlu1 %v2049_v43, %s1663_s26 }
 0x1ba   :  { %558 = vrot.lane.b32.xlu0 %v2043_v28, %s1664_s27  ;;  %544 = vrot.lane.b32.xlu1 %v2055_v45, %s1663_s26 }
 0x1be   :  { %570 = vrot.lane.b32.xlu0 %v2041_v27, %s1665_s28  ;;  %556 = vrot.lane.b32.xlu1 %v2049_v43, %s1664_s27 }
 0x1c2   :  { %574 = vrot.lane.b32.xlu0 %v2043_v28, %s1665_s28  ;;  %560 = vrot.lane.b32.xlu1 %v2055_v45, %s1664_s27 }
 0x1c6   :  { %586 = vrot.lane.b32.xlu0 %v2041_v27, %s1667_s29  ;;  %572 = vrot.lane.b32.xlu1 %v2049_v43, %s1665_s28 }
 0x1ca   :  { %590 = vrot.lane.b32.xlu0 %v2043_v28, %s1667_s29  ;;  %576 = vrot.lane.b32.xlu1 %v2055_v45, %s1665_s28 }
 0x1ce   :  { %628 = vperm.xlu0 %1655, %v1612_v48   ;;  %588 = vrot.lane.b32.xlu1 %v2049_v43, %s1667_s29 }
 0x1d2   :  { %592 = vrot.lane.b32.xlu1 %v2055_v45, %s1667_s29 }
 0x204   :  { %v479_v51 = vpop.permute.xlu0 %478  ;;  %v475_v36 = vpop.permute.xlu1 %474 }
 0x208   :  { %v491_v53 = vpop.permute.xlu0 %490  ;;  %v477_v54 = vpop.permute.xlu1 %476 }
 0x209   :  { %v484_v59 = vsel %vm33_vm0, %v475_v36, %v477_v54  ;;  %v483_v22 = vsel %vm33_vm0, %v477_v54, %v479_v51 }
 0x20a   :  { %v487_v7 = vmul.f32 %v484_v59, %v1811_v19 }
 0x20c   :  { %v495_v55 = vpop.permute.xlu0 %494  ;;  %v481_v56 = vpop.permute.xlu1 %480 }
 0x20d   :  { %v482_v14 = vsel %vm33_vm0, %v479_v51, %v481_v56  ;;  %v485_v21 = vsel %vm33_vm0, %v481_v56, %v475_v36  ;;  %v488_v51 = vmul.f32 %v483_v22, %v1835_v30 }
 0x20e   :  { %v486_v59 = vmul.f32 %v485_v21, %v1819_v24 }
 0x210   :  { %v507_v63 = vpop.permute.xlu0 %506  ;;  %v493_v5 = vpop.permute.xlu1 %492 }
 0x211   :  { %v500_v6 = vsel %vm72_vm1, %v491_v53, %v493_v5  ;;  %v499_v12 = vsel %vm72_vm1, %v493_v5, %v495_v55  ;;  %v489_v5 = vmul.f32 %v482_v14, %v1825_v26 }
 0x212   :  { %v503_v13 = vmul.f32 %v500_v6, %v1814_v20  ;;  %v504_v42 = vmul.f32 %v499_v12, %v1842_v34 }
 0x214   :  { %v511_v23 = vpop.permute.xlu0 %510  ;;  %v497_v33 = vpop.permute.xlu1 %496  ;;  %v603_v37 = vpack.c.bf16 %v503_v13, %v487_v7  ;;  %v604_v13 = vpack.c.bf16 %v504_v42, %v488_v51 }
 0x215   :  { %v498_v44 = vsel %vm72_vm1, %v495_v55, %v497_v33  ;;  %v501_v48 = vsel %vm72_vm1, %v497_v33, %v491_v53 }
 0x216   :  { %v502_v36 = vmul.f32 %v501_v48, %v1822_v25  ;;  %v505_v56 = vmul.f32 %v498_v44, %v1832_v29  ;;  %646 = vmatprep.subr.bf16.mxu0 %v603_v37 }
 0x218   :  { %v602_v54 = vpack.c.bf16 %v502_v36, %v486_v59  ;;  %v523_v6 = vpop.permute.xlu0 %522  ;;  %v509_v7 = vpop.permute.xlu1 %508  ;;  %v605_v12 = vpack.c.bf16 %v505_v56, %v489_v5 }
 0x219   :  { %v516_v14 = vsel %vm112_vm2, %v507_v63, %v509_v7  ;;  %v515_v5 = vsel %vm112_vm2, %v509_v7, %v511_v23 }
 0x21a   :  { %647 = vmatpush1.bf16.msra.mxu0 %v602_v54  ;;  %687 = vmatprep.subr.bf16.mxu1 %v605_v12  ;;  %v519_v22 = vmul.f32 %v516_v14, %v1866_v57 }
 0x21b   :  { %688 = vmatpush1.bf16.msra.mxu1 %v604_v13 }
 0x21c   :  { %v527_v53 = vpop.permute.xlu0 %526  ;;  %v513_v55 = vpop.permute.xlu1 %512 }
 0x21d   :  { %v514_v48 = vsel %vm112_vm2, %v511_v23, %v513_v55  ;;  %v517_v59 = vsel %vm112_vm2, %v513_v55, %v507_v63  ;;  %v520_v23 = vmul.f32 %v515_v5, %v1878_v61 }
 0x21e   :  { %v518_v14 = vmul.f32 %v517_v59, %v1875_v60 }
 0x220   :  { %v539_v21 = vpop.permute.xlu0 %538  ;;  %v525_v33 = vpop.permute.xlu1 %524 }
 0x221   :  { %v532_v37 = vsel %vm152_vm3, %v523_v6, %v525_v33  ;;  %v531_v44 = vsel %vm152_vm3, %v525_v33, %v527_v53  ;;  %v521_v33 = vmul.f32 %v514_v48, %v1881_v62 }
 0x222   :  { %v535_v42 = vmul.f32 %v532_v37, %v1870_v58  ;;  %v536_v54 = vmul.f32 %v531_v44, %v1891_v9 }
 0x224   :  { %v543_v36 = vpop.permute.xlu0 %542  ;;  %v529_v56 = vpop.permute.xlu1 %528  ;;  %v607_v51 = vpack.c.bf16 %v535_v42, %v519_v22  ;;  %v608_v42 = vpack.c.bf16 %v536_v54, %v520_v23 }
 0x225   :  { %v530_v12 = vsel %vm152_vm3, %v527_v53, %v529_v56  ;;  %v533_v13 = vsel %vm152_vm3, %v529_v56, %v523_v6 }
 0x226   :  { %v534_v63 = vmul.f32 %v533_v13, %v1888_v8  ;;  %v537_v55 = vmul.f32 %v530_v12, %v1898_v15  ;;  %648 = vmatprep.subr.bf16.mxu0 %v607_v51 }
 0x228   :  { %v606_v7 = vpack.c.bf16 %v534_v63, %v518_v14  ;;  %v555_v37 = vpop.permute.xlu0 %554  ;;  %v541_v22 = vpop.permute.xlu1 %540  ;;  %v609_v44 = vpack.c.bf16 %v537_v55, %v521_v33 }
 0x229   :  { %v547_v53 = vsel %vm192_vm4, %v541_v22, %v543_v36  ;;  %v548_v6 = vsel %vm192_vm4, %v539_v21, %v541_v22 }
 0x22a   :  { %v550_v48 = vmul.f32 %v548_v6, %v1919_v46  ;;  %v551_v59 = vmul.f32 %v547_v53, %v1927_v49  ;;  %649 = vmatpush1.bf16.msra.mxu0 %v606_v7  ;;  %689 = vmatprep.subr.bf16.mxu1 %v609_v44 }
 0x22b   :  { %690 = vmatpush1.bf16.msra.mxu1 %v608_v42 }
 0x22c   :  { %v610_v5 = vpack.c.bf16 %v550_v48, %v2041_v27  ;;  %v559_v56 = vpop.permute.xlu0 %558  ;;  %v545_v51 = vpop.permute.xlu1 %544  ;;  %v611_v12 = vpack.c.bf16 %v551_v59, %v2049_v43 }
 0x22d   :  { %v546_v54 = vsel %vm192_vm4, %v543_v36, %v545_v51  ;;  %v549_v13 = vsel %vm192_vm4, %v545_v51, %v539_v21 }
 0x22e   :  { %v552_v14 = vmul.f32 %v546_v54, %v1930_v50  ;;  %v553_v33 = vmul.f32 %v549_v13, %v1922_v47  ;;  %650 = vmatprep.subr.bf16.mxu0 %v611_v12 }
 0x22f   :  { %651 = vmatpush1.bf16.msra.mxu0 %v610_v5 }
 0x230   :  { %v612_v63 = vpack.c.bf16 %v552_v14, %v2043_v28  ;;  %v571_v55 = vpop.permute.xlu0 %570  ;;  %v557_v23 = vpop.permute.xlu1 %556  ;;  %v613_v7 = vpack.c.bf16 %v553_v33, %v2055_v45 }
 0x231   :  { %v563_v36 = vsel %vm232_vm6, %v557_v23, %v559_v56  ;;  %v564_v21 = vsel %vm232_vm6, %v555_v37, %v557_v23 }
 0x232   :  { %691 = vmatprep.subr.bf16.mxu1 %v613_v7  ;;  %v566_v48 = vmul.f32 %v564_v21, %v1985_v41  ;;  %v567_v59 = vmul.f32 %v563_v36, %v1958_v1 }
 0x233   :  { %692 = vmatpush1.bf16.msra.mxu1 %v612_v63 }
 0x234   :  { %v575_v22 = vpop.permute.xlu0 %574  ;;  %v561_v44 = vpop.permute.xlu1 %560 }
 0x235   :  { %v562_v54 = vsel %vm232_vm6, %v559_v56, %v561_v44  ;;  %v565_v13 = vsel %vm232_vm6, %v561_v44, %v555_v37 }
 0x236   :  { %v568_v36 = vmul.f32 %v562_v54, %v1963_v32  ;;  %v569_v21 = vmul.f32 %v565_v13, %v1955_v0 }
 0x238   :  { %v573_v42 = vpop.permute.xlu1 %572  ;;  %v587_v5 = vpop.permute.xlu0 %586 }
 0x239   :  { %v579_v53 = vsel %vm272_vm5, %v573_v42, %v575_v22  ;;  %v580_v6 = vsel %vm272_vm5, %v571_v55, %v573_v42 }
 0x23a   :  { %v582_v51 = vmul.f32 %v580_v6, %v1968_v35  ;;  %v583_v12 = vmul.f32 %v579_v53, %v1979_v39 }
 0x23c   :  { %v614_v14 = vpack.c.bf16 %v582_v51, %v566_v48  ;;  %v577_v33 = vpop.permute.xlu1 %576  ;;  %v615_v63 = vpack.c.bf16 %v583_v12, %v567_v59  ;;  %v591_v37 = vpop.permute.xlu0 %590 }
 0x23d   :  { %v578_v23 = vsel %vm272_vm5, %v575_v22, %v577_v33  ;;  %v581_v7 = vsel %vm272_vm5, %v577_v33, %v571_v55 }
 0x23e   :  { %v584_v42 = vmul.f32 %v578_v23, %v1982_v40  ;;  %v585_v56 = vmul.f32 %v581_v7, %v1976_v38  ;;  %652 = vmatprep.subr.bf16.mxu0 %v615_v63  ;;  %v1611_v7 = vld [vmem:[%s2778_s1 + $0x8] sm:$0xff] }
 0x23f   :  { %653 = vmatpush1.bf16.msra.mxu0 %v614_v14 }
 0x240   :  { %v616_v44 = vpack.c.bf16 %v584_v42, %v568_v36  ;;  %v589_v53 = vpop.permute.xlu1 %588  ;;  %v617_v6 = vpack.c.bf16 %v585_v56, %v569_v21 }
 0x241   :  { %v595_v22 = vsel %vm312_vm7, %v589_v53, %v591_v37  ;;  %v596_v55 = vsel %vm312_vm7, %v587_v5, %v589_v53 }
 0x242   :  { %v598_v48 = vmul.f32 %v596_v55, %v1995_v52  ;;  %v599_v59 = vmul.f32 %v595_v22, %v2015_v2  ;;  %693 = vmatprep.subr.bf16.mxu1 %v617_v6 }
 0x243   :  { %694 = vmatpush1.bf16.msra.mxu1 %v616_v44 }
 0x244   :  { %v618_v51 = vpack.c.bf16 %v598_v48, %v598_v48  ;;  %v619_v12 = vpack.c.bf16 %v599_v59, %v599_v59  ;;  %v593_v54 = vpop.permute.xlu1 %592 }
 0x245   :  { %v594_v13 = vsel %vm312_vm7, %v591_v37, %v593_v54  ;;  %v597_v14 = vsel %vm312_vm7, %v593_v54, %v587_v5 }
 0x246   :  { %v600_v33 = vmul.f32 %v594_v13, %v2019_v31  ;;  %v601_v63 = vmul.f32 %v597_v14, %v2012_v3  ;;  %1613 = vmatprep.subr.msk.bf16.mxu0 %vm375_vm8, %v619_v12  ;;  %v635_v23 = vsel %vm375_vm8, %v618_v51, 0 }
 0x247   :  { %655 = vmatpush1.bf16.msra.mxu0 %v635_v23 }
 0x248   :  { %v620_v36 = vpack.c.bf16 %v600_v33, %v600_v33  ;;  %v621_v21 = vpack.c.bf16 %v601_v63, %v601_v63  ;;  %v1626_v63 = vld [vmem:[%s2776_s2 + $0x10] sm:$0xff] }
 0x24a   :  { %1614 = vmatmul.mubr.msk.bf16.vlgmr.msra.gmra.mrb[4].mxu0 %vm371_vm9, %v1611_v7  ;;  %1615 = vmatprep.subr.msk.bf16.mxu1 %vm375_vm8, %v621_v21  ;;  %v641_v5 = vsel %vm375_vm8, %v620_v36, 0  ;;  %v1617_v36 = vld [vmem:[%s2777_s3 + $0x24] sm:$0xf] }
 0x24b   :  { %696 = vmatpush1.bf16.msra.mxu1 %v641_v5  ;;  %1128 = vmatprep.mubr.bf16.mxu0 %v1666_v4  ;;  %v1618_v5 = vld [vmem:[%s2777_s3 + $0x28] sm:$0xf]  ;;  %v759_v45 = vrot.slane %v1617_v36, %v1807_v18 }
 0x24d   :  { %v629_v42 = vpop.permute.xlu0 %628 }
 0x24e   :  { %1616 = vmatmul.mubr.msk.bf16.vlgmr.msra.gmra.mrb[4].mxu1 %vm371_vm9, %v1611_v7 }
 0x24f   :  { %1169 = vmatprep.mubr.bf16.mxu1 %v1666_v4 }
 0x31d   :  { %v680_v56 = vpop.f32.mrb[4].mxu0 }
 0x31e   :  { %v681_v37 = vadd.f32 %v680_v56, %v629_v42  ;;  %v682_v44 = vpop.f32.mrb[5].mxu0  ;;  %v755_v56 = vrot.slane %v1617_v36, %v1794_v11 }
 0x31f   :  { %v683_v53 = vadd.f32 %v682_v44, %v629_v42  ;;  %v684_v6 = vpop.f32.mrb[6].mxu0 }
 0x320   :  { %v2227_v22 = vmax.f32 %v681_v37, 0.0  ;;  %v685_v55 = vpop.f32.mrb[7].mxu0  ;;  %v795_v37 = vrot.slane %v1618_v5, %v1794_v11 }
 0x321   :  { %v2229_v48 = vmax.f32 %v683_v53, 0.0  ;;  %v721_v59 = vpop.f32.mrb[4].mxu1  ;;  %v751_v55 = vrot.slane %v1617_v36, %v1803_v16 }
 0x322   :  { %v722_v51 = vadd.f32 %v721_v59, %v629_v42  ;;  %732 = vrot.lane.b32.xlu1 %v2227_v22, %s1668_s9  ;;  %v723_v12 = vpop.f32.mrb[5].mxu1  ;;  %v763_v59 = vrot.slane %v1617_v36, %v1805_v17 }
 0x323   :  { %v724_v54 = vadd.f32 %v723_v12, %v629_v42  ;;  %734 = vrot.lane.b32.xlu0 %v2229_v48, %s1668_s9  ;;  %v725_v4 = vpop.f32.mrb[6].mxu1  ;;  %v799_v12 = vrot.slane %v1618_v5, %v1807_v18 }
 0x324   :  { %v2233_v13 = vmax.f32 %v722_v51, 0.0  ;;  %v726_v14 = vpop.f32.mrb[7].mxu1 }
 0x325   :  { %v2235_v33 = vmax.f32 %v724_v54, 0.0  ;;  %v791_v14 = vrot.slane %v1618_v5, %v1803_v16 }
 0x326   :  { %736 = vrot.lane.b32.xlu1 %v2233_v13, %s1668_s9 }
 0x327   :  { %738 = vrot.lane.b32.xlu0 %v2235_v33, %s1668_s9 }
 0x32a   :  { %772 = vrot.lane.b32.xlu1 %v2227_v22, %s1669_s10 }
 0x32b   :  { %774 = vrot.lane.b32.xlu0 %v2229_v48, %s1669_s10 }
 0x32e   :  { %776 = vrot.lane.b32.xlu1 %v2233_v13, %s1669_s10 }
 0x32f   :  { %778 = vrot.lane.b32.xlu0 %v2235_v33, %s1669_s10 }
 0x332   :  { %812 = vrot.lane.b32.xlu1 %v2227_v22, %s1670_s11 }
 0x333   :  { %814 = vrot.lane.b32.xlu0 %v2229_v48, %s1670_s11 }
 0x336   :  { %816 = vrot.lane.b32.xlu1 %v2233_v13, %s1670_s11 }
 0x337   :  { %818 = vrot.lane.b32.xlu0 %v2235_v33, %s1670_s11 }
 0x33a   :  { %852 = vrot.lane.b32.xlu1 %v2227_v22, %s1671_s12 }
 0x33b   :  { %854 = vrot.lane.b32.xlu0 %v2229_v48, %s1671_s12 }
 0x33e   :  { %856 = vrot.lane.b32.xlu1 %v2233_v13, %s1671_s12 }
 0x33f   :  { %858 = vrot.lane.b32.xlu0 %v2235_v33, %s1671_s12 }
 0x342   :  { %892 = vrot.lane.b32.xlu1 %v2227_v22, %s1672_s13 }
 0x343   :  { %894 = vrot.lane.b32.xlu0 %v2229_v48, %s1672_s13 }
 0x346   :  { %896 = vrot.lane.b32.xlu1 %v2233_v13, %s1672_s13 }
 0x347   :  { %898 = vrot.lane.b32.xlu0 %v2235_v33, %s1672_s13 }
 0x34a   :  { %932 = vrot.lane.b32.xlu1 %v2227_v22, %s1673_s14 }
 0x34b   :  { %934 = vrot.lane.b32.xlu0 %v2229_v48, %s1673_s14 }
 0x34e   :  { %936 = vrot.lane.b32.xlu1 %v2233_v13, %s1673_s14 }
 0x34f   :  { %938 = vrot.lane.b32.xlu0 %v2235_v33, %s1673_s14 }
 0x352   :  { %972 = vrot.lane.b32.xlu1 %v2227_v22, %s1674_s15 }
 0x353   :  { %974 = vrot.lane.b32.xlu0 %v2229_v48, %s1674_s15 }
 0x356   :  { %976 = vrot.lane.b32.xlu1 %v2233_v13, %s1674_s15 }
 0x357   :  { %978 = vrot.lane.b32.xlu0 %v2235_v33, %s1674_s15 }
 0x35a   :  { %1012 = vrot.lane.b32.xlu1 %v2227_v22, %s1675_s16 }
 0x35b   :  { %1014 = vrot.lane.b32.xlu0 %v2229_v48, %s1675_s16 }
 0x35e   :  { %1016 = vrot.lane.b32.xlu1 %v2233_v13, %s1675_s16 }
 0x35f   :  { %1018 = vrot.lane.b32.xlu0 %v2235_v33, %s1675_s16 }
 0x362   :  { %1078 = vperm.xlu1 %1656, %v1626_v63   ;;  %v803_v63 = vrot.slane %v1618_v5, %v1805_v17 }
 0x363   :  { %1182 = vrot.lane.b32.xlu0 %v2227_v22, %s1659_s19 }
 0x366   :  { %1184 = vrot.lane.b32.xlu1 %v2229_v48, %s1659_s19 }
 0x367   :  { %1186 = vrot.lane.b32.xlu0 %v2233_v13, %s1659_s19 }
 0x36a   :  { %1188 = vrot.lane.b32.xlu1 %v2235_v33, %s1659_s19 }
 0x36b   :  { %1198 = vrot.lane.b32.xlu0 %v2227_v22, %s1660_s24 }
 0x36e   :  { %1200 = vrot.lane.b32.xlu1 %v2229_v48, %s1660_s24 }
 0x36f   :  { %1202 = vrot.lane.b32.xlu0 %v2233_v13, %s1660_s24 }
 0x372   :  { %1204 = vrot.lane.b32.xlu1 %v2235_v33, %s1660_s24 }
 0x373   :  { %1214 = vrot.lane.b32.xlu0 %v2227_v22, %s1661_s0 }
 0x376   :  { %1216 = vrot.lane.b32.xlu1 %v2229_v48, %s1661_s0 }
 0x377   :  { %1218 = vrot.lane.b32.xlu0 %v2233_v13, %s1661_s0 }
 0x37a   :  { %1220 = vrot.lane.b32.xlu1 %v2235_v33, %s1661_s0 }
 0x37b   :  { %1230 = vrot.lane.b32.xlu0 %v2227_v22, %s1662_s25 }
 0x37e   :  { %1232 = vrot.lane.b32.xlu1 %v2229_v48, %s1662_s25 }
 0x37f   :  { %1234 = vrot.lane.b32.xlu0 %v2233_v13, %s1662_s25 }
 0x382   :  { %1236 = vrot.lane.b32.xlu1 %v2235_v33, %s1662_s25 }
 0x383   :  { %1246 = vrot.lane.b32.xlu0 %v2227_v22, %s1663_s26 }
 0x386   :  { %1248 = vrot.lane.b32.xlu1 %v2229_v48, %s1663_s26 }
 0x387   :  { %1250 = vrot.lane.b32.xlu0 %v2233_v13, %s1663_s26 }
 0x38a   :  { %1252 = vrot.lane.b32.xlu1 %v2235_v33, %s1663_s26 }
 0x38b   :  { %1262 = vrot.lane.b32.xlu0 %v2227_v22, %s1664_s27 }
 0x38e   :  { %1264 = vrot.lane.b32.xlu1 %v2229_v48, %s1664_s27 }
 0x38f   :  { %1266 = vrot.lane.b32.xlu0 %v2233_v13, %s1664_s27 }
 0x392   :  { %1268 = vrot.lane.b32.xlu1 %v2235_v33, %s1664_s27 }
 0x393   :  { %1278 = vrot.lane.b32.xlu0 %v2227_v22, %s1665_s28 }
 0x394   :  { %v733_v23 = vpop.permute.xlu1 %732 }
 0x395   :  { %v735_v7 = vpop.permute.xlu0 %734 }
 0x396   :  { %1280 = vrot.lane.b32.xlu1 %v2229_v48, %s1665_s28  ;;  %v743_v44 = vsel %vm740_vm10, %v733_v23, %v735_v7 }
 0x397   :  { %1282 = vrot.lane.b32.xlu0 %v2233_v13, %s1665_s28  ;;  %v769_v54 = vmul.f32 %v755_v56, %v743_v44 }
 0x398   :  { %v737_v21 = vpop.permute.xlu1 %736 }
 0x399   :  { %v739_v42 = vpop.permute.xlu0 %738  ;;  %v742_v56 = vsel %vm740_vm10, %v735_v7, %v737_v21 }
 0x39a   :  { %1284 = vrot.lane.b32.xlu1 %v2235_v33, %s1665_s28  ;;  %v741_v28 = vsel %vm740_vm10, %v737_v21, %v739_v42  ;;  %v744_v43 = vsel %vm740_vm10, %v739_v42, %v733_v23  ;;  %v770_v7 = vmul.f32 %v759_v45, %v742_v56  ;;  %vm980_vm10 = vcmp.lt.s32.totalorder %v1792_v10, 96 }
 0x39b   :  { %1294 = vrot.lane.b32.xlu0 %v2227_v22, %s1667_s29  ;;  %v768_v23 = vmul.f32 %v751_v55, %v744_v43  ;;  %v771_v42 = vmul.f32 %v763_v59, %v741_v28  ;;  %v1620_v28 = vld [vmem:[%s2777_s3 + $0x30] sm:$0xf] }
 0x39c   :  { %v773_v53 = vpop.permute.xlu1 %772 }
 0x39d   :  { %v775_v6 = vpop.permute.xlu0 %774 }
 0x39e   :  { %v783_v51 = vsel %vm780_vm11, %v773_v53, %v775_v6  ;;  %1296 = vrot.lane.b32.xlu1 %v2229_v48, %s1667_s29 }
 0x39f   :  { %v809_v4 = vmul.f32 %v795_v37, %v783_v51  ;;  %1298 = vrot.lane.b32.xlu0 %v2233_v13, %s1667_s29 }
 0x3a0   :  { %v777_v27 = vpop.permute.xlu1 %776 }
 0x3a1   :  { %v782_v37 = vsel %vm780_vm11, %v775_v6, %v777_v27  ;;  %v779_v44 = vpop.permute.xlu0 %778  ;;  %v1053_v51 = vpack.c.bf16 %v809_v4, %v769_v54 }
 0x3a2   :  { %v810_v31 = vmul.f32 %v799_v12, %v782_v37  ;;  %v781_v5 = vsel %vm780_vm11, %v777_v27, %v779_v44  ;;  %v784_v36 = vsel %vm780_vm11, %v779_v44, %v773_v53  ;;  %1300 = vrot.lane.b32.xlu1 %v2235_v33, %s1667_s29  ;;  %v1619_v27 = vld [vmem:[%s2777_s3 + $0x2c] sm:$0xf]  ;;  %v871_v44 = vrot.slane %v1620_v28, %v1803_v16 }
 0x3a3   :  { %v808_v3 = vmul.f32 %v791_v14, %v784_v36  ;;  %v811_v52 = vmul.f32 %v803_v63, %v781_v5  ;;  %1096 = vmatprep.subr.bf16.mxu0 %v1053_v51  ;;  %v831_v59 = vrot.slane %v1619_v27, %v1803_v16  ;;  %v843_v4 = vrot.slane %v1619_v27, %v1805_v17 }
 0x3a4   :  { %v813_v21 = vpop.permute.xlu1 %812  ;;  %v1054_v12 = vpack.c.bf16 %v810_v31, %v770_v7  ;;  %v879_v63 = vrot.slane %v1620_v28, %v1807_v18  ;;  %v883_v51 = vrot.slane %v1620_v28, %v1805_v17  ;;  %v839_v5 = vrot.slane %v1619_v27, %v1807_v18 }
 0x3a5   :  { %v1052_v6 = vpack.c.bf16 %v808_v3, %v768_v23  ;;  %v815_v2 = vpop.permute.xlu0 %814  ;;  %v1055_v54 = vpack.c.bf16 %v811_v52, %v771_v42  ;;  %v835_v3 = vrot.slane %v1619_v27, %v1794_v11  ;;  %v875_v52 = vrot.slane %v1620_v28, %v1794_v11 }
 0x3a6   :  { %v823_v31 = vsel %vm820_vm12, %v813_v21, %v815_v2  ;;  %vm1020_vm11 = vcmp.lt.s32.totalorder %v1792_v10, 94 }
 0x3a7   :  { %1097 = vmatpush1.bf16.msra.mxu0 %v1052_v6  ;;  %1137 = vmatprep.subr.bf16.mxu1 %v1055_v54  ;;  %v849_v56 = vmul.f32 %v835_v3, %v823_v31 }
 0x3a8   :  { %1138 = vmatpush1.bf16.msra.mxu1 %v1054_v12  ;;  %v817_v53 = vpop.permute.xlu1 %816 }
 0x3a9   :  { %v819_v43 = vpop.permute.xlu0 %818  ;;  %v822_v7 = vsel %vm820_vm12, %v815_v2, %v817_v53 }
 0x3aa   :  { %v821_v36 = vsel %vm820_vm12, %v817_v53, %v819_v43  ;;  %v824_v23 = vsel %vm820_vm12, %v819_v43, %v813_v21  ;;  %v1621_v21 = vld [vmem:[%s2777_s3 + $0x38] sm:$0xf]  ;;  %v850_v31 = vmul.f32 %v839_v5, %v822_v7 }
 0x3ab   :  { %v848_v43 = vmul.f32 %v831_v59, %v824_v23  ;;  %v851_v2 = vmul.f32 %v843_v4, %v821_v36  ;;  %v919_v59 = vrot.slane %v1621_v21, %v1807_v18  ;;  %v923_v4 = vrot.slane %v1621_v21, %v1805_v17 }
 0x3ac   :  { %v853_v45 = vpop.permute.xlu1 %852 }
 0x3ad   :  { %v855_v55 = vpop.permute.xlu0 %854 }
 0x3ae   :  { %v863_v14 = vsel %vm860_vm13, %v853_v45, %v855_v55 }
 0x3af   :  { %v889_v37 = vmul.f32 %v875_v52, %v863_v14 }
 0x3b0   :  { %v857_v42 = vpop.permute.xlu1 %856 }
 0x3b1   :  { %v862_v6 = vsel %vm860_vm13, %v855_v55, %v857_v42  ;;  %v859_v54 = vpop.permute.xlu0 %858  ;;  %v1057_v12 = vpack.c.bf16 %v889_v37, %v849_v56 }
 0x3b2   :  { %v890_v3 = vmul.f32 %v879_v63, %v862_v6  ;;  %v861_v28 = vsel %vm860_vm13, %v857_v42, %v859_v54  ;;  %v864_v27 = vsel %vm860_vm13, %v859_v54, %v853_v45  ;;  %v911_v63 = vrot.slane %v1621_v21, %v1803_v16 }
 0x3b3   :  { %v888_v53 = vmul.f32 %v871_v44, %v864_v27  ;;  %v891_v52 = vmul.f32 %v883_v51, %v861_v28  ;;  %1098 = vmatprep.subr.bf16.mxu0 %v1057_v12  ;;  %v915_v6 = vrot.slane %v1621_v21, %v1794_v11 }
 0x3b4   :  { %v893_v55 = vpop.permute.xlu1 %892  ;;  %v1058_v42 = vpack.c.bf16 %v890_v3, %v850_v31 }
 0x3b5   :  { %v1056_v14 = vpack.c.bf16 %v888_v53, %v848_v43  ;;  %v895_v56 = vpop.permute.xlu0 %894  ;;  %v1059_v37 = vpack.c.bf16 %v891_v52, %v851_v2 }
 0x3b6   :  { %v903_v45 = vsel %vm900_vm14, %v893_v55, %v895_v56 }
 0x3b7   :  { %1099 = vmatpush1.bf16.msra.mxu0 %v1056_v14  ;;  %1139 = vmatprep.subr.bf16.mxu1 %v1059_v37  ;;  %v928_v51 = vmul.f32 %v911_v63, %v903_v45  ;;  %v1623_v14 = vld [vmem:[%s2777_s3 + $0x40] sm:$0xf] }
 0x3b8   :  { %1140 = vmatpush1.bf16.msra.mxu1 %v1058_v42  ;;  %v897_v44 = vpop.permute.xlu1 %896  ;;  %v991_v42 = vrot.slane %v1623_v14, %v1803_v16 }
 0x3b9   :  { %v902_v5 = vsel %vm900_vm14, %v895_v56, %v897_v44  ;;  %v899_v36 = vpop.permute.xlu0 %898  ;;  %v1060_v21 = vpack.c.bf16 %v928_v51, %v2227_v22  ;;  %v1624_v51 = vld [vmem:[%s2777_s3 + $0x44] sm:$0xf] }
 0x3ba   :  { %v929_v23 = vmul.f32 %v915_v6, %v902_v5  ;;  %v901_v7 = vsel %vm900_vm14, %v897_v44, %v899_v36  ;;  %v904_v54 = vsel %vm900_vm14, %v899_v36, %v893_v55  ;;  %v1622_v55 = vld [vmem:[%s2777_s3 + $0x3c] sm:$0xf]  ;;  %v995_v44 = vrot.slane %v1623_v14, %v1794_v11 }
 0x3bb   :  { %v930_v12 = vmul.f32 %v919_v59, %v901_v7  ;;  %v931_v3 = vmul.f32 %v923_v4, %v904_v54  ;;  %v951_v56 = vrot.slane %v1622_v55, %v1803_v16  ;;  %v955_v37 = vrot.slane %v1622_v55, %v1794_v11 }
 0x3bc   :  { %v933_v28 = vpop.permute.xlu1 %932  ;;  %v1061_v27 = vpack.c.bf16 %v929_v23, %v2229_v48  ;;  %v959_v59 = vrot.slane %v1622_v55, %v1807_v18  ;;  %v963_v36 = vrot.slane %v1622_v55, %v1805_v17  ;;  %v999_v23 = vrot.slane %v1623_v14, %v1807_v18 }
 0x3bd   :  { %v1062_v43 = vpack.c.bf16 %v930_v12, %v2233_v13  ;;  %v935_v2 = vpop.permute.xlu0 %934  ;;  %v1063_v53 = vpack.c.bf16 %v931_v3, %v2235_v33  ;;  %v1003_v7 = vrot.slane %v1623_v14, %v1805_v17 }
 0x3be   :  { %1100 = vmatprep.subr.bf16.mxu0 %v1061_v27  ;;  %v943_v6 = vsel %vm940_vm15, %v933_v28, %v935_v2 }
 0x3bf   :  { %1101 = vmatpush1.bf16.msra.mxu0 %v1060_v21  ;;  %1141 = vmatprep.subr.bf16.mxu1 %v1063_v53  ;;  %v968_v27 = vmul.f32 %v951_v56, %v943_v6  ;;  %v1031_v53 = vrot.slane %v1624_v51, %v1803_v16 }
 0x3c0   :  { %1142 = vmatpush1.bf16.msra.mxu1 %v1062_v43  ;;  %v937_v52 = vpop.permute.xlu1 %936 }
 0x3c1   :  { %v939_v31 = vpop.permute.xlu0 %938  ;;  %v942_v5 = vsel %vm940_vm15, %v935_v2, %v937_v52 }
 0x3c2   :  { %v941_v54 = vsel %vm940_vm15, %v937_v52, %v939_v31  ;;  %v944_v12 = vsel %vm940_vm15, %v939_v31, %v933_v28  ;;  %v969_v55 = vmul.f32 %v955_v37, %v942_v5  ;;  %v1035_v37 = vrot.slane %v1624_v51, %v1794_v11 }
 0x3c3   :  { %v970_v28 = vmul.f32 %v959_v59, %v941_v54  ;;  %v971_v31 = vmul.f32 %v963_v36, %v944_v12  ;;  %v1043_v59 = vrot.slane %v1624_v51, %v1805_v17 }
 0x3c4   :  { %v973_v63 = vpop.permute.xlu1 %972 }
 0x3c5   :  { %v975_v45 = vpop.permute.xlu0 %974 }
 0x3c6   :  { %v983_v4 = vsel %vm980_vm10, %v973_v63, %v975_v45 }
 0x3c7   :  { %v1008_v21 = vmul.f32 %v991_v42, %v983_v4 }
 0x3c8   :  { %v977_v3 = vpop.permute.xlu1 %976 }
 0x3c9   :  { %v982_v43 = vsel %vm980_vm10, %v975_v45, %v977_v3  ;;  %v979_v2 = vpop.permute.xlu0 %978  ;;  %v1064_v6 = vpack.c.bf16 %v1008_v21, %v968_v27  ;;  %v1625_v27 = vld [vmem:[%s2778_s1 + $0x10] sm:$0xff] }
 0x3ca   :  { %v1009_v38 = vmul.f32 %v995_v44, %v982_v43  ;;  %v981_v14 = vsel %vm980_vm10, %v977_v3, %v979_v2  ;;  %v984_v52 = vsel %vm980_vm10, %v979_v2, %v973_v63  ;;  %v1039_v63 = vrot.slane %v1624_v51, %v1807_v18 }
 0x3cb   :  { %v1010_v40 = vmul.f32 %v999_v23, %v981_v14  ;;  %v1011_v0 = vmul.f32 %v1003_v7, %v984_v52 }
 0x3cc   :  { %v1013_v56 = vpop.permute.xlu1 %1012  ;;  %v1065_v42 = vpack.c.bf16 %v1009_v38, %v969_v55 }
 0x3cd   :  { %v1066_v4 = vpack.c.bf16 %v1010_v40, %v970_v28  ;;  %v1015_v45 = vpop.permute.xlu0 %1014  ;;  %v1067_v32 = vpack.c.bf16 %v1011_v0, %v971_v31 }
 0x3ce   :  { %v1023_v16 = vsel %vm1020_vm11, %v1013_v56, %v1015_v45  ;;  %1102 = vmatprep.subr.bf16.mxu0 %v1065_v42 }
 0x3cf   :  { %v1048_v44 = vmul.f32 %v1031_v53, %v1023_v16  ;;  %1103 = vmatpush1.bf16.msra.mxu0 %v1064_v6  ;;  %1143 = vmatprep.subr.bf16.mxu1 %v1067_v32 }
 0x3d0   :  { %1144 = vmatpush1.bf16.msra.mxu1 %v1066_v4  ;;  %v1017_v5 = vpop.permute.xlu1 %1016 }
 0x3d1   :  { %v1022_v38 = vsel %vm1020_vm11, %v1015_v45, %v1017_v5  ;;  %v1019_v40 = vpop.permute.xlu0 %1018  ;;  %v1068_v0 = vpack.c.bf16 %v1048_v44, %v1048_v44 }
 0x3d2   :  { %v1049_v36 = vmul.f32 %v1035_v37, %v1022_v38  ;;  %v1021_v23 = vsel %vm1020_vm11, %v1017_v5, %v1019_v40  ;;  %v1024_v11 = vsel %vm1020_vm11, %v1019_v40, %v1013_v56 }
 0x3d3   :  { %v1050_v7 = vmul.f32 %v1039_v63, %v1021_v23  ;;  %v1051_v32 = vmul.f32 %v1043_v59, %v1024_v11  ;;  %v1085_v51 = vsel %vm375_vm8, %v1068_v0, 0 }
 0x3d4   :  { %v1069_v54 = vpack.c.bf16 %v1049_v36, %v1049_v36 }
 0x3d5   :  { %v1070_v18 = vpack.c.bf16 %v1050_v7, %v1050_v7  ;;  %v1071_v12 = vpack.c.bf16 %v1051_v32, %v1051_v32  ;;  %v1183_v17 = vpop.permute.xlu0 %1182 }
 0x3d6   :  { %1627 = vmatprep.subr.msk.bf16.mxu0 %vm375_vm8, %v1069_v54 }
 0x3d7   :  { %1105 = vmatpush1.bf16.msra.mxu0 %v1085_v51  ;;  %1629 = vmatprep.subr.msk.bf16.mxu1 %vm375_vm8, %v1071_v12  ;;  %v1091_v3 = vsel %vm375_vm8, %v1070_v18, 0  ;;  %vm1489_vm8 = vcmask 130048  }
 0x3d8   :  { %1146 = vmatpush1.bf16.msra.mxu1 %v1091_v3 }
 0x3d9   :  { %v1187_v21 = vpop.permute.xlu0 %1186 }
 0x3da   :  { %1628 = vmatmul.mubr.msk.bf16.vlgmr.msra.gmra.mrb[8].mxu0 %vm371_vm9, %v1625_v27 }
 0x3db   :  { %1630 = vmatmul.mubr.msk.bf16.vlgmr.msra.gmra.mrb[8].mxu1 %vm371_vm9, %v1625_v27 }
 0x3dd   :  { %v1199_v43 = vpop.permute.xlu0 %1198 }
 0x3e1   :  { %v1203_v2 = vpop.permute.xlu0 %1202  ;;  %v2475_v53 = vpop.permute.xlu1 %1078 }
 0x3e5   :  { %v1215_v55 = vpop.permute.xlu0 %1214  ;;  %v1185_v14 = vpop.permute.xlu1 %1184 }
 0x3e6   :  { %v1192_v31 = vsel %vm33_vm0, %v1183_v17, %v1185_v14  ;;  %v1191_v63 = vsel %vm33_vm0, %v1185_v14, %v1187_v21 }
 0x3e7   :  { %v1195_v4 = vmul.f32 %v1192_v31, %v1811_v19  ;;  %v1196_v54 = vmul.f32 %v1191_v63, %v1835_v30 }
 0x3e9   :  { %v1219_v52 = vpop.permute.xlu0 %1218  ;;  %v1189_v28 = vpop.permute.xlu1 %1188 }
 0x3ea   :  { %v1190_v37 = vsel %vm33_vm0, %v1187_v21, %v1189_v28  ;;  %v1193_v44 = vsel %vm33_vm0, %v1189_v28, %v1183_v17 }
 0x3eb   :  { %v1194_v23 = vmul.f32 %v1193_v44, %v1819_v24  ;;  %v1197_v11 = vmul.f32 %v1190_v37, %v1825_v26 }
 0x3ed   :  { %v1231_v56 = vpop.permute.xlu0 %1230  ;;  %v1201_v42 = vpop.permute.xlu1 %1200 }
 0x3ee   :  { %v1208_v6 = vsel %vm72_vm1, %v1199_v43, %v1201_v42  ;;  %v1207_v45 = vsel %vm72_vm1, %v1201_v42, %v1203_v2 }
 0x3ef   :  { %v1211_v16 = vmul.f32 %v1208_v6, %v1814_v20  ;;  %v1212_v40 = vmul.f32 %v1207_v45, %v1842_v34 }
 0x3f1   :  { %v1235_v59 = vpop.permute.xlu0 %1234  ;;  %v1205_v5 = vpop.permute.xlu1 %1204  ;;  %v1439_v38 = vpack.c.bf16 %v1211_v16, %v1195_v4  ;;  %v1440_v51 = vpack.c.bf16 %v1212_v40, %v1196_v54 }
 0x3f2   :  { %v1206_v0 = vsel %vm72_vm1, %v1203_v2, %v1205_v5  ;;  %v1209_v36 = vsel %vm72_vm1, %v1205_v5, %v1199_v43 }
 0x3f3   :  { %v1210_v7 = vmul.f32 %v1209_v36, %v1822_v25  ;;  %v1213_v32 = vmul.f32 %v1206_v0, %v1832_v29  ;;  %1493 = vmatprep.subr.bf16.mxu0 %v1439_v38 }
 0x3f5   :  { %v1438_v18 = vpack.c.bf16 %v1210_v7, %v1194_v23  ;;  %v1217_v12 = vpop.permute.xlu1 %1216  ;;  %v1441_v17 = vpack.c.bf16 %v1213_v32, %v1197_v11  ;;  %v1247_v3 = vpop.permute.xlu0 %1246 }
 0x3f6   :  { %v1224_v21 = vsel %vm112_vm2, %v1215_v55, %v1217_v12  ;;  %v1223_v45 = vsel %vm112_vm2, %v1217_v12, %v1219_v52 }
 0x3f7   :  { %1494 = vmatpush1.bf16.msra.mxu0 %v1438_v18  ;;  %1534 = vmatprep.subr.bf16.mxu1 %v1441_v17  ;;  %v1227_v28 = vmul.f32 %v1224_v21, %v1866_v57 }
 0x3f8   :  { %1535 = vmatpush1.bf16.msra.mxu1 %v1440_v51 }
 0x3f9   :  { %v1221_v27 = vpop.permute.xlu1 %1220  ;;  %v1251_v43 = vpop.permute.xlu0 %1250 }
 0x3fa   :  { %v1222_v6 = vsel %vm112_vm2, %v1219_v52, %v1221_v27  ;;  %v1225_v4 = vsel %vm112_vm2, %v1221_v27, %v1215_v55  ;;  %v1228_v52 = vmul.f32 %v1223_v45, %v1878_v61 }
 0x3fb   :  { %v1226_v38 = vmul.f32 %v1225_v4, %v1875_v60  ;;  %v1229_v40 = vmul.f32 %v1222_v6, %v1881_v62 }
 0x3fd   :  { %v1233_v2 = vpop.permute.xlu1 %1232  ;;  %v1263_v0 = vpop.permute.xlu0 %1262 }
 0x3fe   :  { %v1240_v14 = vsel %vm152_vm3, %v1231_v56, %v1233_v2  ;;  %v1239_v31 = vsel %vm152_vm3, %v1233_v2, %v1235_v59 }
 0x3ff   :  { %v1243_v42 = vmul.f32 %v1240_v14, %v1870_v58  ;;  %v1244_v44 = vmul.f32 %v1239_v31, %v1891_v9 }
 0x401   :  { %v1237_v16 = vpop.permute.xlu1 %1236  ;;  %v1443_v37 = vpack.c.bf16 %v1243_v42, %v1227_v28  ;;  %v1444_v32 = vpack.c.bf16 %v1244_v44, %v1228_v52  ;;  %v1267_v12 = vpop.permute.xlu0 %1266 }
 0x402   :  { %v1238_v63 = vsel %vm152_vm3, %v1235_v59, %v1237_v16  ;;  %v1241_v5 = vsel %vm152_vm3, %v1237_v16, %v1231_v56 }
 0x403   :  { %v1242_v55 = vmul.f32 %v1241_v5, %v1888_v8  ;;  %v1245_v36 = vmul.f32 %v1238_v63, %v1898_v15  ;;  %1495 = vmatprep.subr.bf16.mxu0 %v1443_v37 }
 0x405   :  { %v1442_v23 = vpack.c.bf16 %v1242_v55, %v1226_v38  ;;  %v1249_v11 = vpop.permute.xlu1 %1248  ;;  %v1445_v7 = vpack.c.bf16 %v1245_v36, %v1229_v40  ;;  %v1279_v6 = vpop.permute.xlu0 %1278 }
 0x406   :  { %v1255_v59 = vsel %vm192_vm4, %v1249_v11, %v1251_v43  ;;  %v1256_v56 = vsel %vm192_vm4, %v1247_v3, %v1249_v11  ;;  %v2812_v11 = vld [vmem:[#allocation3_spill] sm:$0xff] }
 0x407   :  { %v1258_v54 = vmul.f32 %v1256_v56, %v1919_v46  ;;  %v1259_v18 = vmul.f32 %v1255_v59, %v1927_v49  ;;  %1496 = vmatpush1.bf16.msra.mxu0 %v1442_v23  ;;  %1536 = vmatprep.subr.bf16.mxu1 %v1445_v7  ;;  %v2814_v56 = vld [vmem:[#allocation5_spill] sm:$0xff] }
 0x408   :  { %1537 = vmatpush1.bf16.msra.mxu1 %v1444_v32  ;;  %v2813_v32 = vld [vmem:[#allocation2_spill] sm:$0xff] }
 0x409   :  { %v1446_v17 = vpack.c.bf16 %v1258_v54, %v2227_v22  ;;  %v1253_v51 = vpop.permute.xlu1 %1252  ;;  %v1447_v27 = vpack.c.bf16 %v1259_v18, %v2229_v48  ;;  %v1283_v4 = vpop.permute.xlu0 %1282  ;;  %v2815_v18 = vld [vmem:[#allocation4_spill] sm:$0xff] }
 0x40a   :  { %v1254_v21 = vsel %vm192_vm4, %v1251_v43, %v1253_v51  ;;  %v1257_v2 = vsel %vm192_vm4, %v1253_v51, %v1247_v3 }
 0x40b   :  { %v1260_v14 = vmul.f32 %v1254_v21, %v1930_v50  ;;  %v1261_v28 = vmul.f32 %v1257_v2, %v1922_v47  ;;  %1497 = vmatprep.subr.bf16.mxu0 %v1447_v27 }
 0x40c   :  { %1498 = vmatpush1.bf16.msra.mxu0 %v1446_v17 }
 0x40d   :  { %v1448_v31 = vpack.c.bf16 %v1260_v14, %v2233_v13  ;;  %v1265_v42 = vpop.permute.xlu1 %1264  ;;  %v1449_v22 = vpack.c.bf16 %v1261_v28, %v2235_v33 }
 0x40e   :  { %v1271_v43 = vsel %vm232_vm6, %v1265_v42, %v1267_v12  ;;  %v1272_v3 = vsel %vm232_vm6, %v1263_v0, %v1265_v42 }
 0x40f   :  { %1538 = vmatprep.subr.bf16.mxu1 %v1449_v22  ;;  %v1274_v33 = vmul.f32 %v1272_v3, %v1985_v41  ;;  %v1275_v37 = vmul.f32 %v1271_v43, %v1958_v1 }
 0x410   :  { %1539 = vmatpush1.bf16.msra.mxu1 %v1448_v31 }
 0x411   :  { %v1269_v48 = vpop.permute.xlu1 %1268 }
 0x412   :  { %v1270_v5 = vsel %vm232_vm6, %v1267_v12, %v1269_v48  ;;  %v1273_v38 = vsel %vm232_vm6, %v1269_v48, %v1263_v0 }
 0x413   :  { %v1276_v7 = vmul.f32 %v1270_v5, %v2812_v11  ;;  %v1277_v59 = vmul.f32 %v1273_v38, %v2813_v32 }
 0x415   :  { %v1281_v45 = vpop.permute.xlu1 %1280 }
 0x416   :  { %v1287_v16 = vsel %vm272_vm5, %v1281_v45, %v1283_v4  ;;  %v1288_v13 = vsel %vm272_vm5, %v1279_v6, %v1281_v45 }
 0x417   :  { %v1290_v44 = vmul.f32 %v1288_v13, %v1968_v35  ;;  %v1291_v63 = vmul.f32 %v1287_v16, %v1979_v39 }
 0x419   :  { %v1450_v40 = vpack.c.bf16 %v1290_v44, %v1274_v33  ;;  %v1285_v55 = vpop.permute.xlu1 %1284  ;;  %v1451_v36 = vpack.c.bf16 %v1291_v63, %v1275_v37  ;;  %v1632_v33 = vld [vmem:[%s2776_s2 + $0x18] sm:$0xff]  ;;  %v1295_v37 = vpop.permute.xlu0 %1294 }
 0x41a   :  { %v1286_v52 = vsel %vm272_vm5, %v1283_v4, %v1285_v55  ;;  %v1289_v23 = vsel %vm272_vm5, %v1285_v55, %v1279_v6 }
 0x41b   :  { %v1292_v54 = vmul.f32 %v1286_v52, %v2814_v56  ;;  %v1293_v12 = vmul.f32 %v1289_v23, %v2815_v18  ;;  %1499 = vmatprep.subr.bf16.mxu0 %v1451_v36  ;;  %v2816_v52 = vld [vmem:[#allocation8_spill] sm:$0xff] }
 0x41c   :  { %1500 = vmatpush1.bf16.msra.mxu0 %v1450_v40 }
 0x41d   :  { %v1452_v0 = vpack.c.bf16 %v1292_v54, %v1276_v7  ;;  %v1453_v17 = vpack.c.bf16 %v1293_v12, %v1277_v59  ;;  %v1297_v44 = vpop.permute.xlu1 %1296  ;;  %v1299_v63 = vpop.permute.xlu0 %1298 }
 0x41e   :  { %v1303_v38 = vsel %vm312_vm7, %v1297_v44, %v1299_v63  ;;  %v1304_v59 = vsel %vm312_vm7, %v1295_v37, %v1297_v44 }
 0x41f   :  { %1540 = vmatprep.subr.bf16.mxu1 %v1453_v17  ;;  %v1307_v23 = vmul.f32 %v1303_v38, %v2816_v52 }
 0x420   :  { %1541 = vmatpush1.bf16.msra.mxu1 %v1452_v0 }
 0x421   :  { %v1301_v5 = vpop.permute.xlu1 %1300 }
 0x422   :  { %v1305_v54 = vsel %vm312_vm7, %v1301_v5, %v1295_v37  ;;  %v1302_v0 = vsel %vm312_vm7, %v1299_v63, %v1301_v5 }
 0x4ad   :  { %v1130_v51 = vpop.f32.mrb[8].mxu0 }
 0x4ae   :  { %v1131_v27 = vadd.f32 %v1130_v51, %v2475_v53  ;;  %v1132_v21 = vpop.f32.mrb[9].mxu0  ;;  %v1171_v2 = vpop.f32.mrb[8].mxu1 }
 0x4af   :  { %v1133_v14 = vadd.f32 %v1132_v21, %v2475_v53  ;;  %v1134_v28 = vpop.f32.mrb[10].mxu0  ;;  %v1173_v31 = vpop.f32.mrb[9].mxu1  ;;  %v1172_v22 = vadd.f32 %v1171_v2, %v2475_v53 }
 0x4b0   :  { %v2567_v42 = vmax.f32 %v1131_v27, 0.0  ;;  %v1135_v6 = vpop.f32.mrb[11].mxu0  ;;  %v1175_v48 = vpop.f32.mrb[10].mxu1  ;;  %v1174_v3 = vadd.f32 %v1173_v31, %v2475_v53  ;;  %v2634_v53 = vld [vmem:[%s2778_s1 + $0x18] sm:$0xff]  ;;  %v2818_v31 = vld [vmem:[#allocation7_spill] sm:$0xff] }
 0x4b1   :  { %v2570_v43 = vmax.f32 %v1133_v14, 0.0  ;;  %v1176_v4 = vpop.f32.mrb[11].mxu1  ;;  %v2577_v45 = vmax.f32 %v1172_v22, 0.0  ;;  %v1634_v13 = vcombine.high %v2634_v53, %v2634_v53  ;;  %v2817_v14 = vld [vmem:[#allocation6_spill] sm:$0xff]  ;;  %v1309_v22 = vmul.f32 %v1305_v54, %v2818_v31 }
 0x4b2   :  { %1310 = vrot.lane.b32.xlu0 %v2567_v42, %s1659_s19  ;;  %v2579_v16 = vmax.f32 %v1174_v3, 0.0  ;;  %v1306_v28 = vmul.f32 %v1304_v59, %v2817_v14  ;;  %v2819_v3 = vld [vmem:[#allocation9_spill] sm:$0xff] }
 0x4b3   :  { %1312 = vrot.lane.b32.xlu1 %v2570_v43, %s1659_s19  ;;  %1635 = vmatprep.mubr.msk.bf16.mxu0 %vm1489_vm8, %v1634_v13  ;;  %v1308_v4 = vmul.f32 %v1302_v0, %v2819_v3 }
 0x4b4   :  { %1636 = vmatprep.mubr.msk.bf16.mxu1 %vm1489_vm8, %v1634_v13 }
 0x4b6   :  { %1314 = vrot.lane.b32.xlu0 %v2577_v45, %s1659_s19 }
 0x4b7   :  { %1316 = vrot.lane.b32.xlu1 %v2579_v16, %s1659_s19 }
 0x4ba   :  { %1326 = vrot.lane.b32.xlu0 %v2567_v42, %s1660_s24 }
 0x4bb   :  { %1328 = vrot.lane.b32.xlu1 %v2570_v43, %s1660_s24 }
 0x4be   :  { %1330 = vrot.lane.b32.xlu0 %v2577_v45, %s1660_s24 }
 0x4bf   :  { %1332 = vrot.lane.b32.xlu1 %v2579_v16, %s1660_s24 }
 0x4c2   :  { %1342 = vrot.lane.b32.xlu0 %v2567_v42, %s1661_s0 }
 0x4c3   :  { %1344 = vrot.lane.b32.xlu1 %v2570_v43, %s1661_s0 }
 0x4c6   :  { %1346 = vrot.lane.b32.xlu0 %v2577_v45, %s1661_s0 }
 0x4c7   :  { %1348 = vrot.lane.b32.xlu1 %v2579_v16, %s1661_s0 }
 0x4ca   :  { %1358 = vrot.lane.b32.xlu0 %v2567_v42, %s1662_s25 }
 0x4cb   :  { %1360 = vrot.lane.b32.xlu1 %v2570_v43, %s1662_s25 }
 0x4ce   :  { %1362 = vrot.lane.b32.xlu0 %v2577_v45, %s1662_s25 }
 0x4cf   :  { %1364 = vrot.lane.b32.xlu1 %v2579_v16, %s1662_s25 }
 0x4d2   :  { %1374 = vrot.lane.b32.xlu0 %v2567_v42, %s1663_s26 }
 0x4d3   :  { %1376 = vrot.lane.b32.xlu1 %v2570_v43, %s1663_s26 }
 0x4d6   :  { %1378 = vrot.lane.b32.xlu0 %v2577_v45, %s1663_s26 }
 0x4d7   :  { %1380 = vrot.lane.b32.xlu1 %v2579_v16, %s1663_s26 }
 0x4da   :  { %1390 = vrot.lane.b32.xlu0 %v2567_v42, %s1664_s27 }
 0x4db   :  { %1392 = vrot.lane.b32.xlu1 %v2570_v43, %s1664_s27 }
 0x4de   :  { %1394 = vrot.lane.b32.xlu0 %v2577_v45, %s1664_s27 }
 0x4df   :  { %1396 = vrot.lane.b32.xlu1 %v2579_v16, %s1664_s27 }
 0x4e2   :  { %1406 = vrot.lane.b32.xlu0 %v2567_v42, %s1665_s28 }
 0x4e3   :  { %1408 = vrot.lane.b32.xlu1 %v2570_v43, %s1665_s28 }
 0x4e6   :  { %1410 = vrot.lane.b32.xlu0 %v2577_v45, %s1665_s28 }
 0x4e7   :  { %1412 = vrot.lane.b32.xlu1 %v2579_v16, %s1665_s28 }
 0x4ea   :  { %1422 = vrot.lane.b32.xlu0 %v2567_v42, %s1667_s29 }
 0x4eb   :  { %1424 = vrot.lane.b32.xlu1 %v2570_v43, %s1667_s29 }
 0x4ee   :  { %1426 = vrot.lane.b32.xlu0 %v2577_v45, %s1667_s29 }
 0x4ef   :  { %1428 = vrot.lane.b32.xlu1 %v2579_v16, %s1667_s29 }
 0x4f2   :  { %1480 = vperm.xlu0 %1655, %v1632_v33  }
 0x524   :  { %v1311_v40 = vpop.permute.xlu0 %1310 }
 0x525   :  { %v1313_v55 = vpop.permute.xlu1 %1312 }
 0x526   :  { %v1320_v36 = vsel %vm33_vm0, %v1311_v40, %v1313_v55 }
 0x527   :  { %v1323_v7 = vmul.f32 %v1320_v36, %v1811_v19 }
 0x528   :  { %v1315_v12 = vpop.permute.xlu0 %1314 }
 0x529   :  { %v1319_v17 = vsel %vm33_vm0, %v1313_v55, %v1315_v12  ;;  %v1317_v51 = vpop.permute.xlu1 %1316  ;;  %v1455_v27 = vpack.c.bf16 %v1323_v7, %v1307_v23 }
 0x52a   :  { %v1324_v21 = vmul.f32 %v1319_v17, %v1835_v30  ;;  %v1318_v19 = vsel %vm33_vm0, %v1315_v12, %v1317_v51  ;;  %v1321_v2 = vsel %vm33_vm0, %v1317_v51, %v1311_v40 }
 0x52b   :  { %v1322_v6 = vmul.f32 %v1321_v2, %v1819_v24  ;;  %v1325_v48 = vmul.f32 %v1318_v19, %v1825_v26  ;;  %1501 = vmatprep.subr.bf16.mxu0 %v1455_v27 }
 0x52c   :  { %v1327_v13 = vpop.permute.xlu0 %1326  ;;  %v1456_v44 = vpack.c.bf16 %v1324_v21, %v1308_v4 }
 0x52d   :  { %v1454_v33 = vpack.c.bf16 %v1322_v6, %v1306_v28  ;;  %v1329_v30 = vpop.permute.xlu1 %1328  ;;  %v1457_v37 = vpack.c.bf16 %v1325_v48, %v1309_v22 }
 0x52e   :  { %v1336_v38 = vsel %vm72_vm1, %v1327_v13, %v1329_v30 }
 0x52f   :  { %1502 = vmatpush1.bf16.msra.mxu0 %v1454_v33  ;;  %1542 = vmatprep.subr.bf16.mxu1 %v1457_v37  ;;  %v1339_v55 = vmul.f32 %v1336_v38, %v1814_v20 }
 0x530   :  { %v1331_v63 = vpop.permute.xlu0 %1330  ;;  %1543 = vmatpush1.bf16.msra.mxu1 %v1456_v44 }
 0x531   :  { %v1333_v5 = vpop.permute.xlu1 %1332  ;;  %v1335_v54 = vsel %vm72_vm1, %v1329_v30, %v1331_v63 }
 0x532   :  { %v1334_v23 = vsel %vm72_vm1, %v1331_v63, %v1333_v5  ;;  %v1337_v7 = vsel %vm72_vm1, %v1333_v5, %v1327_v13  ;;  %v1340_v28 = vmul.f32 %v1335_v54, %v1842_v34 }
 0x533   :  { %v1338_v27 = vmul.f32 %v1337_v7, %v1822_v25  ;;  %v1341_v21 = vmul.f32 %v1334_v23, %v1832_v29 }
 0x534   :  { %v1343_v40 = vpop.permute.xlu0 %1342 }
 0x535   :  { %v1345_v24 = vpop.permute.xlu1 %1344 }
 0x536   :  { %v1352_v26 = vsel %vm112_vm2, %v1343_v40, %v1345_v24 }
 0x537   :  { %v1355_v36 = vmul.f32 %v1352_v26, %v1866_v57 }
 0x538   :  { %v1347_v59 = vpop.permute.xlu0 %1346 }
 0x539   :  { %v1351_v12 = vsel %vm112_vm2, %v1345_v24, %v1347_v59  ;;  %v1349_v0 = vpop.permute.xlu1 %1348  ;;  %v1459_v17 = vpack.c.bf16 %v1355_v36, %v1339_v55 }
 0x53a   :  { %v1356_v51 = vmul.f32 %v1351_v12, %v1878_v61  ;;  %v1350_v20 = vsel %vm112_vm2, %v1347_v59, %v1349_v0  ;;  %v1353_v57 = vsel %vm112_vm2, %v1349_v0, %v1343_v40 }
 0x53b   :  { %v1354_v19 = vmul.f32 %v1353_v57, %v1875_v60  ;;  %v1357_v2 = vmul.f32 %v1350_v20, %v1881_v62  ;;  %1503 = vmatprep.subr.bf16.mxu0 %v1459_v17 }
 0x53c   :  { %v1359_v22 = vpop.permute.xlu0 %1358  ;;  %v1460_v4 = vpack.c.bf16 %v1356_v51, %v1340_v28 }
 0x53d   :  { %v1458_v6 = vpack.c.bf16 %v1354_v19, %v1338_v27  ;;  %v1361_v61 = vpop.permute.xlu1 %1360  ;;  %v1461_v48 = vpack.c.bf16 %v1357_v2, %v1341_v21 }
 0x53e   :  { %v1368_v13 = vsel %vm152_vm3, %v1359_v22, %v1361_v61 }
 0x53f   :  { %v1371_v33 = vmul.f32 %v1368_v13, %v1870_v58  ;;  %1504 = vmatpush1.bf16.msra.mxu0 %v1458_v6  ;;  %1544 = vmatprep.subr.bf16.mxu1 %v1461_v48 }
 0x540   :  { %v1363_v25 = vpop.permute.xlu0 %1362  ;;  %1545 = vmatpush1.bf16.msra.mxu1 %v1460_v4 }
 0x541   :  { %v1367_v29 = vsel %vm152_vm3, %v1361_v61, %v1363_v25  ;;  %v1365_v60 = vpop.permute.xlu1 %1364  ;;  %v1463_v34 = vpack.c.bf16 %v2570_v43, %v1371_v33 }
 0x542   :  { %v1372_v62 = vmul.f32 %v1367_v29, %v1891_v9  ;;  %v1366_v30 = vsel %vm152_vm3, %v1363_v25, %v1365_v60  ;;  %v1369_v37 = vsel %vm152_vm3, %v1365_v60, %v1359_v22 }
 0x543   :  { %v1370_v58 = vmul.f32 %v1369_v37, %v1888_v8  ;;  %v1373_v44 = vmul.f32 %v1366_v30, %v1898_v15  ;;  %1505 = vmatprep.subr.bf16.mxu0 %v1463_v34 }
 0x544   :  { %v1375_v63 = vpop.permute.xlu0 %1374  ;;  %v1464_v43 = vpack.c.bf16 %v2577_v45, %v1372_v62 }
 0x545   :  { %v1462_v5 = vpack.c.bf16 %v2567_v42, %v1370_v58  ;;  %v1377_v38 = vpop.permute.xlu1 %1376  ;;  %v1465_v40 = vpack.c.bf16 %v2579_v16, %v1373_v44 }
 0x546   :  { %v1384_v8 = vsel %vm192_vm4, %v1375_v63, %v1377_v38 }
 0x547   :  { %1506 = vmatpush1.bf16.msra.mxu0 %v1462_v5  ;;  %1546 = vmatprep.subr.bf16.mxu1 %v1465_v40  ;;  %v1386_v23 = vmul.f32 %v1384_v8, %v1919_v46 }
 0x548   :  { %v1379_v9 = vpop.permute.xlu0 %1378  ;;  %1547 = vmatpush1.bf16.msra.mxu1 %v1464_v43 }
 0x549   :  { %v1381_v24 = vpop.permute.xlu1 %1380  ;;  %v1383_v42 = vsel %vm192_vm4, %v1377_v38, %v1379_v9 }
 0x54a   :  { %v1382_v16 = vsel %vm192_vm4, %v1379_v9, %v1381_v24  ;;  %v1385_v45 = vsel %vm192_vm4, %v1381_v24, %v1375_v63  ;;  %v1387_v12 = vmul.f32 %v1383_v42, %v1927_v49 }
 0x54b   :  { %v1388_v20 = vmul.f32 %v1382_v16, %v1930_v50  ;;  %v1389_v46 = vmul.f32 %v1385_v45, %v1922_v47  ;;  %v2820_v16 = vld [vmem:[#allocation10_spill] sm:$0xff] }
 0x54c   :  { %v1391_v26 = vpop.permute.xlu0 %1390 }
 0x54d   :  { %v1393_v55 = vpop.permute.xlu1 %1392 }
 0x54e   :  { %v1400_v15 = vsel %vm232_vm6, %v1391_v26, %v1393_v55 }
 0x54f   :  { %v1402_v7 = vmul.f32 %v1400_v15, %v1985_v41 }
 0x550   :  { %v1395_v36 = vpop.permute.xlu0 %1394 }
 0x551   :  { %v1399_v59 = vsel %vm232_vm6, %v1393_v55, %v1395_v36  ;;  %v1397_v54 = vpop.permute.xlu1 %1396  ;;  %v1466_v19 = vpack.c.bf16 %v1402_v7, %v1386_v23  ;;  %v2821_v23 = vld [vmem:[#allocation12_spill] sm:$0xff] }
 0x552   :  { %v1403_v0 = vmul.f32 %v1399_v59, %v1958_v1  ;;  %v1398_v17 = vsel %vm232_vm6, %v1395_v36, %v1397_v54  ;;  %v1401_v51 = vsel %vm232_vm6, %v1397_v54, %v1391_v26  ;;  %v2822_v59 = vld [vmem:[#allocation11_spill] sm:$0xff] }
 0x553   :  { %v1404_v41 = vmul.f32 %v1398_v17, %v2812_v11  ;;  %v1405_v57 = vmul.f32 %v1401_v51, %v2813_v32 }
 0x554   :  { %v1407_v27 = vpop.permute.xlu0 %1406  ;;  %v1467_v21 = vpack.c.bf16 %v1403_v0, %v1387_v12  ;;  %v2823_v12 = vld [vmem:[#allocation13_spill] sm:$0xff] }
 0x555   :  { %v1468_v49 = vpack.c.bf16 %v1404_v41, %v1388_v20  ;;  %v1409_v2 = vpop.permute.xlu1 %1408  ;;  %v1469_v1 = vpack.c.bf16 %v1405_v57, %v1389_v46 }
 0x556   :  { %1507 = vmatprep.subr.bf16.mxu0 %v1467_v21  ;;  %v1416_v47 = vsel %vm272_vm5, %v1407_v27, %v1409_v2 }
 0x557   :  { %1508 = vmatpush1.bf16.msra.mxu0 %v1466_v19  ;;  %1548 = vmatprep.subr.bf16.mxu1 %v1469_v1  ;;  %v1418_v13 = vmul.f32 %v1416_v47, %v1968_v35 }
 0x558   :  { %v1411_v28 = vpop.permute.xlu0 %1410  ;;  %1549 = vmatpush1.bf16.msra.mxu1 %v1468_v49 }
 0x559   :  { %v1413_v22 = vpop.permute.xlu1 %1412  ;;  %v1415_v32 = vsel %vm272_vm5, %v1409_v2, %v1411_v28 }
 0x55a   :  { %v1414_v61 = vsel %vm272_vm5, %v1411_v28, %v1413_v22  ;;  %v1417_v48 = vsel %vm272_vm5, %v1413_v22, %v1407_v27  ;;  %v1419_v60 = vmul.f32 %v1415_v32, %v1979_v39 }
 0x55b   :  { %v1420_v37 = vmul.f32 %v1414_v61, %v2814_v56  ;;  %v1421_v35 = vmul.f32 %v1417_v48, %v2815_v18 }
 0x55c   :  { %v1423_v6 = vpop.permute.xlu0 %1422 }
 0x55d   :  { %v1425_v50 = vpop.permute.xlu1 %1424 }
 0x55e   :  { %v1432_v11 = vsel %vm312_vm7, %v1423_v6, %v1425_v50 }
 0x55f   :  { %v1434_v33 = vmul.f32 %v1432_v11, %v2817_v14 }
 0x560   :  { %v1427_v4 = vpop.permute.xlu0 %1426 }
 0x561   :  { %v1431_v25 = vsel %vm312_vm7, %v1425_v50, %v1427_v4  ;;  %v1429_v29 = vpop.permute.xlu1 %1428  ;;  %v1470_v63 = vpack.c.bf16 %v1434_v33, %v1418_v13 }
 0x562   :  { %v1435_v34 = vmul.f32 %v1431_v25, %v2816_v52  ;;  %v1430_v62 = vsel %vm312_vm7, %v1427_v4, %v1429_v29  ;;  %v1433_v30 = vsel %vm312_vm7, %v1429_v29, %v1423_v6  ;;  %v1633_v52 = vcombine.low %v2634_v53, %v2634_v53 }
 0x563   :  { %v1436_v14 = vmul.f32 %v1430_v62, %v2819_v3  ;;  %v1437_v58 = vmul.f32 %v1433_v30, %v2818_v31 }
 0x564   :  { %v1471_v44 = vpack.c.bf16 %v1435_v34, %v1419_v60 }
 0x565   :  { %v1472_v5 = vpack.c.bf16 %v1436_v14, %v1420_v37  ;;  %v1473_v39 = vpack.c.bf16 %v1437_v58, %v1421_v35 }
 0x566   :  { %1509 = vmatprep.subr.bf16.mxu0 %v1471_v44 }
 0x567   :  { %1510 = vmatpush1.bf16.msra.mxu0 %v1470_v63  ;;  %1550 = vmatprep.subr.bf16.mxu1 %v1473_v39 }
 0x568   :  { %1551 = vmatpush1.bf16.msra.mxu1 %v1472_v5 }
 0x56a   :  { %1526 = vmatmul.mubr.bf16.vlgmr.msra.gmra.mrb[12].mxu0 %v1633_v52 }
 0x56b   :  { %1567 = vmatmul.mubr.bf16.vlgmr.msra.gmra.mrb[12].mxu1 %v1633_v52 }
 0x571   :  { %v1481_v10 = vpop.permute.xlu0 %1480 }
 0x63d   :  { %v1527_v56 = vpop.f32.mrb[12].mxu0 }
 0x63e   :  { %v1528_v18 = vadd.f32 %v1527_v56, %v1481_v10  ;;  %v1529_v38 = vpop.f32.mrb[13].mxu0  ;;  %v1568_v3 = vpop.f32.mrb[12].mxu1 }
 0x63f   :  { %v1530_v40 = vadd.f32 %v1529_v38, %v1481_v10  ;;  %v1569_v31 = vadd.f32 %v1568_v3, %v1481_v10  ;;  %v1531_v43 = vpop.f32.mrb[14].mxu0  ;;  %v1570_v9 = vpop.f32.mrb[13].mxu1 }
 0x640   :  { %v1575_v24 = vmax.f32 %v1528_v18, 0.0  ;;  %v1571_v26 = vadd.f32 %v1570_v9, %v1481_v10  ;;  %v1532_v55 = vpop.f32.mrb[15].mxu0  ;;  %v1572_v8 = vpop.f32.mrb[14].mxu1 }
 0x641   :  { %v1576_v15 = vmax.f32 %v1530_v40, 0.0  ;;  %v1577_v53 = vmax.f32 %v1569_v31, 0.0  ;;  %v1573_v42 = vpop.f32.mrb[15].mxu1 }
 0x642   :  { %v1579_v45 = vadd.f32 %v1575_v24, %v2820_v16  ;;  %v1578_v36 = vmax.f32 %v1571_v26, 0.0 }
 0x643   :  { %v1580_v7 = vadd.f32 %v1576_v15, %v2821_v23  ;;  %v1581_v54 = vadd.f32 %v1577_v53, %v2822_v59 }
 0x644   :  { %v1582_v0 = vadd.f32 %v1578_v36, %v2823_v12 }
 0x645   :  { %v1585_v17 = vcombine.low %v1579_v45, %v1580_v7 }
 0x646   :  { %v1590_v51 = vcombine.low %v1581_v54, %v1582_v0 }
 0x647   :  { %1587 = vst [vmem:[%s2779_s4] sm:$0xff] %v1585_v17 }
 0x648   :  { %1637 = vst [vmem:[%s2779_s4 + $0x8] sm:$0xff] %v1590_v51 }

</bundles_post_ra>
